<compile_context>
chip_gen: v5e
topology: v5e:2x2
jax: 0.10.0
libtpu: 0.0.40
codegen_flags: <defaults>
</compile_context>

<pallas_src>
import functools

import numpy as np
import jax
import jax.numpy as jnp
from jax import lax
from jax.experimental import pallas as pl
from jax.experimental.pallas import tpu as pltpu

PROBE_LINEAR, PROBE_CURVED, PROBE_PHASED = 0, 1, 2


# ----------------------------------------------------------------------------
# scalar glue (plain JAX): keypoint geometry + random top-width sampling
# ----------------------------------------------------------------------------
def _point_of_intersection(x1, y1, x2, y2, x3, y3, x4, y4):
    """Intersection of line (x1,y1)-(x3,y3) with line (x2,y2)-(x4,y4)."""
    dx_l, dy_l = x3 - x1, y3 - y1
    dx_r, dy_r = x4 - x2, y4 - y2
    denom = dx_l * dy_r - dy_l * dx_r
    t = ((x2 - x1) * dy_r - (y2 - y1) * dx_r) / denom
    return x1 + t * dx_l, y1 + t * dy_l


def _angle_of_intersection(x3, y3, x4, y4, x_itn, y_itn):
    v1x, v1y = x3 - x_itn, y3 - y_itn
    v2x, v2y = x4 - x_itn, y4 - y_itn
    cross = v1x * v2y - v1y * v2x
    dot = v1x * v2x + v1y * v2y
    return jnp.arctan2(jnp.abs(cross), dot)


def _compute_scalars(keypoints, probe, key, min_top_width, max_top_width, point_thresh):
    kp = keypoints.astype(jnp.float32)
    x1, y1, x2, y2, x3, y3, x4, y4 = (kp[i] for i in range(8))

    # Phased pointed-top widening affects only the local x1/x2 used for the
    # top-width scale (the apex is computed from the ORIGINAL keypoints, as in
    # the torch reference which calls get_point_of_intersection(*keypoints)).
    x1a, x2a = x1, x2
    if probe == PROBE_PHASED:
        pointed = jnp.abs(x2 - x1) < point_thresh
        x1a = jnp.where(pointed, x1 - 0.5, x1)
        x2a = jnp.where(pointed, x2 + 0.5, x2)

    x_itn, y_itn = _point_of_intersection(x1, y1, x2, y2, x3, y3, x4, y4)
    theta = _angle_of_intersection(x3, y3, x4, y4, x_itn, y_itn)

    top_width = min_top_width + jax.random.uniform(key, (), jnp.float32) * (
        max_top_width - min_top_width)
    tws = top_width / (x2a - x1a) * (x4 - x3)
    new_x1 = x_itn - (x_itn - x1a) * tws
    new_x2 = x_itn + (x2a - x_itn) * tws
    nxi, nyi = _point_of_intersection(new_x1, y1, new_x2, y2, x3, y3, x4, y4)
    new_theta = _angle_of_intersection(x3, y3, x4, y4, nxi, nyi)

    # per-pixel-invariant constants, hoisted once (read from SMEM in the kernel)
    theta_ratio = theta / new_theta
    cos_ratio = jnp.cos(new_theta * 0.5) / jnp.cos(theta * 0.5)
    zero = jnp.zeros((), jnp.float32)
    scalars = jnp.stack(
        [x_itn, y_itn, nxi, nyi, theta_ratio, cos_ratio, zero, zero]).astype(jnp.float32)
    # square_roi=False path: y3 / y4 unchanged
    new_keypoints = jnp.stack([new_x1, y1, new_x2, y2, x3, y3, x4, y4])
    return scalars, new_keypoints


# ----------------------------------------------------------------------------
# Pallas kernel: flow field + separable bilinear grid_sample + mask multiply
# ----------------------------------------------------------------------------
def _warp_sample_kernel(scal_ref, img_ref, out_ref, *, c, h, w, h_pad, w_pad, tile):
    # hoisted warp constants (SMEM)
    x_itn = scal_ref[0]
    y_itn = scal_ref[1]
    nxi = scal_ref[2]
    nyi = scal_ref[3]
    theta_ratio = scal_ref[4]     # theta / new_theta
    cos_ratio = scal_ref[5]       # cos(new_theta/2) / cos(theta/2)

    i = pl.program_id(0)

    # ---- output-pixel (row, col) recovery, lane-dense (1, tile) ----
    lane = lax.broadcasted_iota(jnp.int32, (1, tile), 1)
    p = (i * tile + lane).astype(jnp.float32)        # exact while hw < 2^24
    yy = jnp.floor(p / w)
    rem = p - yy * w                                  # exact f32 integer math
    yy = yy + jnp.where(rem >= w, 1.0, 0.0) - jnp.where(rem < 0.0, 1.0, 0.0)
    xx = p - yy * w                                   # exact column

    # ---- flow field (matches torch reference formulas) ----
    new_phi = jnp.arctan2(xx - nxi, yy - nyi)
    new_r = jnp.sqrt((nxi - xx) ** 2 + (nyi - yy) ** 2)
    rad_ratio = (yy - y_itn) * cos_ratio / (yy - nyi)
    new_xx = x_itn + new_r * rad_ratio * jnp.sin(theta_ratio * new_phi)
    new_yy = y_itn + new_r * rad_ratio * jnp.cos(theta_ratio * new_phi)
    gx = new_xx / w * 2.0 - 1.0
    gy = new_yy / h * 2.0 - 1.0

    # ---- bilinear grid_sample (align_corners=False, padding_mode='zeros') ----
    ix = ((gx + 1.0) * w - 1.0) * 0.5
    iy = ((gy + 1.0) * h - 1.0) * 0.5
    x0 = jnp.floor(ix)
    y0 = jnp.floor(iy)
    wx1 = ix - x0
    wx0 = 1.0 - wx1
    wy1 = iy - y0
    wy0 = 1.0 - wy1

    # per-axis validity (separable); NaN/inf coords compare False -> weight 0
    wx0 = jnp.where((x0 >= 0.0) & (x0 <= w - 1.0), wx0, 0.0)
    wx1 = jnp.where((x0 >= -1.0) & (x0 <= w - 2.0), wx1, 0.0)
    wy0 = jnp.where((y0 >= 0.0) & (y0 <= h - 1.0), wy0, 0.0)
    wy1 = jnp.where((y0 >= -1.0) & (y0 <= h - 2.0), wy1, 0.0)

    # sanitize before int cast (NaN / out-of-range -> harmless row -1;
    # the corresponding weights above are already zero)
    x0s = jnp.where((x0 >= -1.0) & (x0 <= float(w)), x0, -1.0)
    y0s = jnp.where((y0 >= -1.0) & (y0 <= float(h)), y0, -1.0)
    x0i = x0s.astype(jnp.int32)
    y0i = y0s.astype(jnp.int32)

    # ---- separable one-hot weight matrices (nested where: cheaper build) ----
    iota_w = lax.broadcasted_iota(jnp.int32, (w_pad, 1), 0)      # (w_pad, 1)
    iota_h = lax.broadcasted_iota(jnp.int32, (h_pad, 1), 0)      # (h_pad, 1)
    dx = iota_w - x0i                                            # (w_pad, tile)
    dy = iota_h - y0i                                            # (h_pad, tile)
    wx_mat = jnp.where(dx == 0, wx0,
                       jnp.where(dx == 1, wx1, 0.0)).astype(jnp.bfloat16)
    wy_mat = jnp.where(dy == 0, wy0,
                       jnp.where(dy == 1, wy1, 0.0))             # f32

    # ---- fused per-channel gather (MXU) + y-combine (VPU/XLU) ----
    # TODO(synk): band-limit K (w_pad) with a scalar-prefetched per-tile column
    # range once a static band width can be derived from the warp geometry.
    rows = []
    for ch in range(c + 1):                                      # c is tiny; unrolled
        g = jnp.dot(img_ref[pl.ds(ch * h_pad, h_pad), :], wx_mat,
                    preferred_element_type=jnp.float32)          # (h_pad, tile) f32
        rows.append(jnp.sum(g * wy_mat, axis=0, keepdims=True))  # (1, tile)

    mask_row = rows[c]
    # per-row lane-dense stores (no sublane-relayout concatenate)
    for ch in range(c):
        out_ref[pl.ds(ch, 1), :] = rows[ch] * mask_row           # image * warped mask
    out_ref[pl.ds(c, 1), :] = mask_row                           # warped mask


# ----------------------------------------------------------------------------
# tile / VMEM budgeting (generation aware)
# ----------------------------------------------------------------------------
def _round_up(a, b):
    return ((a + b - 1) // b) * b


def _pick_tile_and_vmem(c, h_pad, w_pad, hw):
    try:
        cap = int(pltpu.get_tpu_info().vmem_capacity_bytes)       # per-TC capacity
    except Exception:
        cap = 64 << 20                                            # conservative (v7x)
    cap = max(cap, 32 << 20)
    budget = int(0.75 * cap)

    slab_bytes = (c + 1) * h_pad * w_pad * 2                      # bf16, single-buffered

    def estimate(t):
        out_blk = 2 * (c + 1) * t * 4                             # double-buffered out
        per_px = (2 * h_pad * 4      # per-channel gathered f32 (x2 overlap safety)
                  + h_pad * 12       # wy one-hot build temporaries
                  + w_pad * 16       # wx one-hot build temporaries (f32 before bf16)
                  + 32 * 4)          # lane-dense flow-field temporaries
        return slab_bytes + out_blk + per_px * t + (4 << 20)

    tile = min(128, _round_up(hw, 128))
    for t in (4096, 2048, 1024, 512, 256, 128):                   # multiples of 256/128
        t_eff = min(t, _round_up(hw, 128))
        if estimate(t_eff) <= budget:
            tile = t_eff
            break
    vmem_limit = int(min(cap, max(estimate(tile) + (8 << 20), 32 << 20)))
    return tile, vmem_limit


# ----------------------------------------------------------------------------
# module forward
# ----------------------------------------------------------------------------
def convexity_mutation(image, label, keypoints, mask, probe, key, *,
                       square_roi=False, min_top_width=0.0, max_top_width=0.5,
                       point_thresh=1.0):
    if probe == PROBE_LINEAR:
        return image, label, keypoints, mask, probe
    # TODO(synk): square_roi=True needs data-dependent scalar lookups into the
    # warped flow field (new_yy[-1, x_itn.int()], ...); not implemented here.
    assert not square_roi

    c, h, w = image.shape
    hw = h * w
    h_pad = _round_up(h, 8)        # aligned per-channel sublane slices
    w_pad = _round_up(w, 128)      # K-aligned MXU feed (zero cols never weighted)

    scalars, new_keypoints = _compute_scalars(
        keypoints, probe, key, min_top_width, max_top_width, point_thresh)

    # (c+1, h, w) -> padded -> ((c+1)*h_pad, w_pad) bf16 slab, whole-array in VMEM.
    slab = jnp.concatenate([image.astype(jnp.float32),
                            mask.astype(jnp.float32)], axis=0)
    slab = jnp.pad(slab, ((0, 0), (0, h_pad - h), (0, w_pad - w)))
    slab = slab.reshape((c + 1) * h_pad, w_pad).astype(jnp.bfloat16)

    tile, vmem_limit = _pick_tile_and_vmem(c, h_pad, w_pad, hw)
    hw_pad = _round_up(hw, tile)

    kernel = functools.partial(_warp_sample_kernel, c=c, h=h, w=w,
                               h_pad=h_pad, w_pad=w_pad, tile=tile)

    out_flat = pl.pallas_call(
        kernel,
        out_shape=jax.ShapeDtypeStruct((c + 1, hw_pad), jnp.float32),
        grid_spec=pltpu.PrefetchScalarGridSpec(
            num_scalar_prefetch=0,
            grid=(hw_pad // tile,),
            in_specs=[
                # warp scalars: tiny, scalar-indexed
                pl.BlockSpec(memory_space=pltpu.MemorySpace.SMEM),
                # image+mask slab: whole array resident in VMEM, single copy
                pl.BlockSpec(memory_space=pltpu.MemorySpace.VMEM),
            ],
            out_specs=pl.BlockSpec((c + 1, tile), lambda i: (0, i)),
        ),
        compiler_params=pltpu.CompilerParams(
            dimension_semantics=("parallel",),       # independent output tiles
            vmem_limit_bytes=vmem_limit),
    )(scalars, slab)

    new_image = out_flat[:c, :hw].reshape(c, h, w)
    new_mask = out_flat[c:, :hw].reshape(1, h, w)
    return new_image, label, new_keypoints, new_mask, probe


# ----------------------------------------------------------------------------
# pure-JAX reference (for correctness check)
# ----------------------------------------------------------------------------
def _ref_grid_sample(img, gx, gy):
    _, h, w = img.shape
    ix = ((gx + 1.0) * w - 1.0) * 0.5
    iy = ((gy + 1.0) * h - 1.0) * 0.5
    x0 = jnp.floor(ix).astype(jnp.int32)
    y0 = jnp.floor(iy).astype(jnp.int32)
    x1, y1 = x0 + 1, y0 + 1
    wx1 = ix - x0
    wx0 = 1.0 - wx1
    wy1 = iy - y0
    wy0 = 1.0 - wy1

    def get(yc, xc):
        valid = ((yc >= 0) & (yc < h) & (xc >= 0) & (xc < w)).astype(jnp.float32)
        v = img[:, jnp.clip(yc, 0, h - 1), jnp.clip(xc, 0, w - 1)]
        return v * valid[None]

    return (get(y0, x0) * (wy0 * wx0)[None] + get(y0, x1) * (wy0 * wx1)[None] +
            get(y1, x0) * (wy1 * wx0)[None] + get(y1, x1) * (wy1 * wx1)[None])


def ref_convexity_mutation(image, mask, keypoints, probe, key):
    c, h, w = image.shape
    scalars, new_kp = _compute_scalars(keypoints, probe, key, 0.0, 0.5, 1.0)
    x_itn, y_itn, nxi, nyi, theta_ratio, cos_ratio = (scalars[i] for i in range(6))
    yy, xx = jnp.meshgrid(jnp.arange(h, dtype=jnp.float32),
                          jnp.arange(w, dtype=jnp.float32), indexing='ij')
    new_phi = jnp.arctan2(xx - nxi, yy - nyi)
    new_r = jnp.sqrt((nxi - xx) ** 2 + (nyi - yy) ** 2)
    rad_ratio = (yy - y_itn) * cos_ratio / (yy - nyi)
    new_xx = x_itn + new_r * rad_ratio * jnp.sin(theta_ratio * new_phi)
    new_yy = y_itn + new_r * rad_ratio * jnp.cos(theta_ratio * new_phi)
    gx = new_xx / w * 2.0 - 1.0
    gy = new_yy / h * 2.0 - 1.0
    si = _ref_grid_sample(image.astype(jnp.float32), gx, gy)
    sm = _ref_grid_sample(mask.astype(jnp.float32), gx, gy)
    return si * sm, sm, new_kp


# ----------------------------------------------------------------------------
if __name__ == "__main__":
    key = jax.random.PRNGKey(0)
    k_img, k_aug = jax.random.split(key)

    c, h, w = 4, 16, 16
    image = jax.random.normal(k_img, (c, h, w), dtype=jnp.float32)

    # beam keypoints [x1,y1,x2,y2,x3,y3,x4,y4]: narrow top, wide bottom (convex beam)
    keypoints = jnp.array([5.0, 1.0, 11.0, 1.0, 1.0, 14.0, 15.0, 14.0], jnp.float32)
    x1, y1, x2, y2, x3, y3, x4, y4 = (keypoints[i] for i in range(8))
    yy, xx = jnp.meshgrid(jnp.arange(h, dtype=jnp.float32),
                          jnp.arange(w, dtype=jnp.float32), indexing='ij')
    left_x = x1 + (x3 - x1) * (yy - y1) / (y3 - y1)
    right_x = x2 + (x4 - x2) * (yy - y2) / (y4 - y2)
    mask = ((xx >= left_x) & (xx <= right_x) &
            (yy >= y1) & (yy <= y3)).astype(jnp.float32)[None]

    label = jnp.int32(1)
    probe = PROBE_CURVED

    new_image, new_label, new_kp, new_mask, new_probe = convexity_mutation(
        image, label, keypoints, mask, probe, k_aug)
    jax.block_until_ready((new_image, new_kp, new_mask))

    # correctness check vs pure-JAX f32 reference (bf16 slab/weights => 3e-2 tol)
    ref_img, ref_mask, ref_kp = ref_convexity_mutation(image, mask, keypoints, probe, k_aug)
    np.testing.assert_allclose(np.asarray(new_image), np.asarray(ref_img),
                               rtol=3e-2, atol=3e-2)
    np.testing.assert_allclose(np.asarray(new_mask), np.asarray(ref_mask),
                               rtol=3e-2, atol=3e-2)
    np.testing.assert_allclose(np.asarray(new_kp), np.asarray(ref_kp),
                               rtol=1e-5, atol=1e-5)

    print("KERNEL_OK")
</pallas_src>

<mosaic_0001>
module attributes {stable_mosaic.version = 11 : i64} {
  func.func @_warp_sample_kernel(%arg0: i32, %arg1: memref<8xf32, #tpu.memory_space<smem>>, %arg2: memref<80x128xbf16, #tpu.memory_space<vmem>>, %arg3: memref<5x256xf32, #tpu.memory_space<vmem>>) attributes {dimension_semantics = [#tpu.dimension_semantics<parallel>], iteration_bounds = array<i64: 1>, scalar_prefetch = 0 : i64, scratch_operands = 0 : i64, tpu.core_type = #tpu.core_type<tc>, window_params = [{transform_indices = @transform_0, window_bounds = array<i64: 8>}, {pipeline_mode = #tpu.pipeline_mode<synchronous>, transform_indices = @transform_1, window_bounds = array<i64: 80, 128>}, {transform_indices = @transform_2, window_bounds = array<i64: 5, 256>}]} {
    %c0 = arith.constant 0 : index
    %0 = memref.load %arg1[%c0] : memref<8xf32, #tpu.memory_space<smem>>
    %c1 = arith.constant 1 : index
    %1 = memref.load %arg1[%c1] : memref<8xf32, #tpu.memory_space<smem>>
    %c2 = arith.constant 2 : index
    %2 = memref.load %arg1[%c2] : memref<8xf32, #tpu.memory_space<smem>>
    %c3 = arith.constant 3 : index
    %3 = memref.load %arg1[%c3] : memref<8xf32, #tpu.memory_space<smem>>
    %c4 = arith.constant 4 : index
    %4 = memref.load %arg1[%c4] : memref<8xf32, #tpu.memory_space<smem>>
    %c5 = arith.constant 5 : index
    %5 = memref.load %arg1[%c5] : memref<8xf32, #tpu.memory_space<smem>>
    %6 = tpu.iota {dimensions = array<i32: 1>} : vector<1x256xi32>
    %c256_i32 = arith.constant 256 : i32
    %7 = arith.muli %arg0, %c256_i32 : i32
    %8 = vector.broadcast %7 : i32 to vector<1x256xi32>
    %9 = arith.addi %8, %6 : vector<1x256xi32>
    %10 = arith.sitofp %9 : vector<1x256xi32> to vector<1x256xf32>
    %cst = arith.constant 1.600000e+01 : f32
    %11 = vector.broadcast %cst : f32 to vector<1x256xf32>
    %12 = arith.divf %10, %11 : vector<1x256xf32>
    %13 = math.floor %12 : vector<1x256xf32>
    %cst_0 = arith.constant 1.600000e+01 : f32
    %14 = vector.broadcast %cst_0 : f32 to vector<1x256xf32>
    %15 = arith.mulf %13, %14 : vector<1x256xf32>
    %16 = arith.subf %10, %15 : vector<1x256xf32>
    %cst_1 = arith.constant 1.600000e+01 : f32
    %17 = vector.broadcast %cst_1 : f32 to vector<1x256xf32>
    %18 = arith.cmpf oge, %16, %17 : vector<1x256xf32>
    %cst_2 = arith.constant 1.000000e+00 : f32
    %cst_3 = arith.constant 0.000000e+00 : f32
    %19 = vector.broadcast %cst_2 : f32 to vector<1x256xf32>
    %20 = vector.broadcast %cst_3 : f32 to vector<1x256xf32>
    %21 = arith.select %18, %19, %20 : vector<1x256xi1>, vector<1x256xf32>
    %22 = arith.addf %13, %21 : vector<1x256xf32>
    %cst_4 = arith.constant 0.000000e+00 : f32
    %23 = vector.broadcast %cst_4 : f32 to vector<1x256xf32>
    %24 = arith.cmpf olt, %16, %23 : vector<1x256xf32>
    %cst_5 = arith.constant 1.000000e+00 : f32
    %cst_6 = arith.constant 0.000000e+00 : f32
    %25 = vector.broadcast %cst_5 : f32 to vector<1x256xf32>
    %26 = vector.broadcast %cst_6 : f32 to vector<1x256xf32>
    %27 = arith.select %24, %25, %26 : vector<1x256xi1>, vector<1x256xf32>
    %28 = arith.subf %22, %27 : vector<1x256xf32>
    %cst_7 = arith.constant 1.600000e+01 : f32
    %29 = vector.broadcast %cst_7 : f32 to vector<1x256xf32>
    %30 = arith.mulf %28, %29 : vector<1x256xf32>
    %31 = arith.subf %10, %30 : vector<1x256xf32>
    %32 = vector.broadcast %2 : f32 to vector<1x256xf32>
    %33 = arith.subf %31, %32 : vector<1x256xf32>
    %34 = vector.broadcast %3 : f32 to vector<1x256xf32>
    %35 = arith.subf %28, %34 : vector<1x256xf32>
    %36 = math.atan2 %33, %35 : vector<1x256xf32>
    %37 = vector.broadcast %2 : f32 to vector<1x256xf32>
    %38 = arith.subf %37, %31 : vector<1x256xf32>
    %39 = arith.mulf %38, %38 : vector<1x256xf32>
    %40 = vector.broadcast %3 : f32 to vector<1x256xf32>
    %41 = arith.subf %40, %28 : vector<1x256xf32>
    %42 = arith.mulf %41, %41 : vector<1x256xf32>
    %43 = arith.addf %39, %42 : vector<1x256xf32>
    %44 = math.sqrt %43 : vector<1x256xf32>
    %45 = vector.broadcast %1 : f32 to vector<1x256xf32>
    %46 = arith.subf %28, %45 : vector<1x256xf32>
    %47 = vector.broadcast %5 : f32 to vector<1x256xf32>
    %48 = arith.mulf %46, %47 : vector<1x256xf32>
    %49 = vector.broadcast %3 : f32 to vector<1x256xf32>
    %50 = arith.subf %28, %49 : vector<1x256xf32>
    %51 = arith.divf %48, %50 : vector<1x256xf32>
    %52 = arith.mulf %44, %51 : vector<1x256xf32>
    %53 = vector.broadcast %4 : f32 to vector<1x256xf32>
    %54 = arith.mulf %53, %36 : vector<1x256xf32>
    %55 = math.sin %54 : vector<1x256xf32>
    %56 = arith.mulf %52, %55 : vector<1x256xf32>
    %57 = vector.broadcast %0 : f32 to vector<1x256xf32>
    %58 = arith.addf %57, %56 : vector<1x256xf32>
    %59 = arith.mulf %44, %51 : vector<1x256xf32>
    %60 = vector.broadcast %4 : f32 to vector<1x256xf32>
    %61 = arith.mulf %60, %36 : vector<1x256xf32>
    %62 = math.cos %61 : vector<1x256xf32>
    %63 = arith.mulf %59, %62 : vector<1x256xf32>
    %64 = vector.broadcast %1 : f32 to vector<1x256xf32>
    %65 = arith.addf %64, %63 : vector<1x256xf32>
    %cst_8 = arith.constant 1.600000e+01 : f32
    %66 = vector.broadcast %cst_8 : f32 to vector<1x256xf32>
    %67 = arith.divf %58, %66 : vector<1x256xf32>
    %cst_9 = arith.constant 2.000000e+00 : f32
    %68 = vector.broadcast %cst_9 : f32 to vector<1x256xf32>
    %69 = arith.mulf %67, %68 : vector<1x256xf32>
    %cst_10 = arith.constant 1.000000e+00 : f32
    %70 = vector.broadcast %cst_10 : f32 to vector<1x256xf32>
    %71 = arith.subf %69, %70 : vector<1x256xf32>
    %cst_11 = arith.constant 1.600000e+01 : f32
    %72 = vector.broadcast %cst_11 : f32 to vector<1x256xf32>
    %73 = arith.divf %65, %72 : vector<1x256xf32>
    %cst_12 = arith.constant 2.000000e+00 : f32
    %74 = vector.broadcast %cst_12 : f32 to vector<1x256xf32>
    %75 = arith.mulf %73, %74 : vector<1x256xf32>
    %cst_13 = arith.constant 1.000000e+00 : f32
    %76 = vector.broadcast %cst_13 : f32 to vector<1x256xf32>
    %77 = arith.subf %75, %76 : vector<1x256xf32>
    %cst_14 = arith.constant 1.000000e+00 : f32
    %78 = vector.broadcast %cst_14 : f32 to vector<1x256xf32>
    %79 = arith.addf %71, %78 : vector<1x256xf32>
    %cst_15 = arith.constant 1.600000e+01 : f32
    %80 = vector.broadcast %cst_15 : f32 to vector<1x256xf32>
    %81 = arith.mulf %79, %80 : vector<1x256xf32>
    %cst_16 = arith.constant 1.000000e+00 : f32
    %82 = vector.broadcast %cst_16 : f32 to vector<1x256xf32>
    %83 = arith.subf %81, %82 : vector<1x256xf32>
    %cst_17 = arith.constant 5.000000e-01 : f32
    %84 = vector.broadcast %cst_17 : f32 to vector<1x256xf32>
    %85 = arith.mulf %83, %84 : vector<1x256xf32>
    %cst_18 = arith.constant 1.000000e+00 : f32
    %86 = vector.broadcast %cst_18 : f32 to vector<1x256xf32>
    %87 = arith.addf %77, %86 : vector<1x256xf32>
    %cst_19 = arith.constant 1.600000e+01 : f32
    %88 = vector.broadcast %cst_19 : f32 to vector<1x256xf32>
    %89 = arith.mulf %87, %88 : vector<1x256xf32>
    %cst_20 = arith.constant 1.000000e+00 : f32
    %90 = vector.broadcast %cst_20 : f32 to vector<1x256xf32>
    %91 = arith.subf %89, %90 : vector<1x256xf32>
    %cst_21 = arith.constant 5.000000e-01 : f32
    %92 = vector.broadcast %cst_21 : f32 to vector<1x256xf32>
    %93 = arith.mulf %91, %92 : vector<1x256xf32>
    %94 = math.floor %85 : vector<1x256xf32>
    %95 = math.floor %93 : vector<1x256xf32>
    %96 = arith.subf %85, %94 : vector<1x256xf32>
    %cst_22 = arith.constant 1.000000e+00 : f32
    %97 = vector.broadcast %cst_22 : f32 to vector<1x256xf32>
    %98 = arith.subf %97, %96 : vector<1x256xf32>
    %99 = arith.subf %93, %95 : vector<1x256xf32>
    %cst_23 = arith.constant 1.000000e+00 : f32
    %100 = vector.broadcast %cst_23 : f32 to vector<1x256xf32>
    %101 = arith.subf %100, %99 : vector<1x256xf32>
    %cst_24 = arith.constant 0.000000e+00 : f32
    %102 = vector.broadcast %cst_24 : f32 to vector<1x256xf32>
    %103 = arith.cmpf oge, %94, %102 : vector<1x256xf32>
    %cst_25 = arith.constant 1.500000e+01 : f32
    %104 = vector.broadcast %cst_25 : f32 to vector<1x256xf32>
    %105 = arith.cmpf ole, %94, %104 : vector<1x256xf32>
    %106 = arith.andi %103, %105 : vector<1x256xi1>
    %cst_26 = arith.constant 0.000000e+00 : f32
    %107 = vector.broadcast %cst_26 : f32 to vector<1x256xf32>
    %108 = arith.select %106, %98, %107 : vector<1x256xi1>, vector<1x256xf32>
    %cst_27 = arith.constant -1.000000e+00 : f32
    %109 = vector.broadcast %cst_27 : f32 to vector<1x256xf32>
    %110 = arith.cmpf oge, %94, %109 : vector<1x256xf32>
    %cst_28 = arith.constant 1.400000e+01 : f32
    %111 = vector.broadcast %cst_28 : f32 to vector<1x256xf32>
    %112 = arith.cmpf ole, %94, %111 : vector<1x256xf32>
    %113 = arith.andi %110, %112 : vector<1x256xi1>
    %cst_29 = arith.constant 0.000000e+00 : f32
    %114 = vector.broadcast %cst_29 : f32 to vector<1x256xf32>
    %115 = arith.select %113, %96, %114 : vector<1x256xi1>, vector<1x256xf32>
    %cst_30 = arith.constant 0.000000e+00 : f32
    %116 = vector.broadcast %cst_30 : f32 to vector<1x256xf32>
    %117 = arith.cmpf oge, %95, %116 : vector<1x256xf32>
    %cst_31 = arith.constant 1.500000e+01 : f32
    %118 = vector.broadcast %cst_31 : f32 to vector<1x256xf32>
    %119 = arith.cmpf ole, %95, %118 : vector<1x256xf32>
    %120 = arith.andi %117, %119 : vector<1x256xi1>
    %cst_32 = arith.constant 0.000000e+00 : f32
    %121 = vector.broadcast %cst_32 : f32 to vector<1x256xf32>
    %122 = arith.select %120, %101, %121 : vector<1x256xi1>, vector<1x256xf32>
    %cst_33 = arith.constant -1.000000e+00 : f32
    %123 = vector.broadcast %cst_33 : f32 to vector<1x256xf32>
    %124 = arith.cmpf oge, %95, %123 : vector<1x256xf32>
    %cst_34 = arith.constant 1.400000e+01 : f32
    %125 = vector.broadcast %cst_34 : f32 to vector<1x256xf32>
    %126 = arith.cmpf ole, %95, %125 : vector<1x256xf32>
    %127 = arith.andi %124, %126 : vector<1x256xi1>
    %cst_35 = arith.constant 0.000000e+00 : f32
    %128 = vector.broadcast %cst_35 : f32 to vector<1x256xf32>
    %129 = arith.select %127, %99, %128 : vector<1x256xi1>, vector<1x256xf32>
    %cst_36 = arith.constant -1.000000e+00 : f32
    %130 = vector.broadcast %cst_36 : f32 to vector<1x256xf32>
    %131 = arith.cmpf oge, %94, %130 : vector<1x256xf32>
    %cst_37 = arith.constant 1.600000e+01 : f32
    %132 = vector.broadcast %cst_37 : f32 to vector<1x256xf32>
    %133 = arith.cmpf ole, %94, %132 : vector<1x256xf32>
    %134 = arith.andi %131, %133 : vector<1x256xi1>
    %cst_38 = arith.constant -1.000000e+00 : f32
    %135 = vector.broadcast %cst_38 : f32 to vector<1x256xf32>
    %136 = arith.select %134, %94, %135 : vector<1x256xi1>, vector<1x256xf32>
    %cst_39 = arith.constant -1.000000e+00 : f32
    %137 = vector.broadcast %cst_39 : f32 to vector<1x256xf32>
    %138 = arith.cmpf oge, %95, %137 : vector<1x256xf32>
    %cst_40 = arith.constant 1.600000e+01 : f32
    %139 = vector.broadcast %cst_40 : f32 to vector<1x256xf32>
    %140 = arith.cmpf ole, %95, %139 : vector<1x256xf32>
    %141 = arith.andi %138, %140 : vector<1x256xi1>
    %cst_41 = arith.constant -1.000000e+00 : f32
    %142 = vector.broadcast %cst_41 : f32 to vector<1x256xf32>
    %143 = arith.select %141, %95, %142 : vector<1x256xi1>, vector<1x256xf32>
    %144 = arith.fptosi %136 : vector<1x256xf32> to vector<1x256xi32>
    %145 = arith.fptosi %143 : vector<1x256xf32> to vector<1x256xi32>
    %146 = tpu.iota {dimensions = array<i32: 0>} : vector<128x1xi32>
    %147 = tpu.iota {dimensions = array<i32: 0>} : vector<16x1xi32>
    %148 = vector.broadcast %146 : vector<128x1xi32> to vector<128x256xi32>
    %149 = vector.broadcast %144 : vector<1x256xi32> to vector<128x256xi32>
    %150 = arith.subi %148, %149 : vector<128x256xi32>
    %151 = vector.broadcast %147 : vector<16x1xi32> to vector<16x256xi32>
    %152 = vector.broadcast %145 : vector<1x256xi32> to vector<16x256xi32>
    %153 = arith.subi %151, %152 : vector<16x256xi32>
    %c0_i32 = arith.constant 0 : i32
    %154 = vector.broadcast %c0_i32 : i32 to vector<128x256xi32>
    %155 = arith.cmpi eq, %150, %154 : vector<128x256xi32>
    %c1_i32 = arith.constant 1 : i32
    %156 = vector.broadcast %c1_i32 : i32 to vector<128x256xi32>
    %157 = arith.cmpi eq, %150, %156 : vector<128x256xi32>
    %cst_42 = arith.constant 0.000000e+00 : f32
    %158 = vector.shape_cast %115 : vector<1x256xf32> to vector<1x256xf32>
    %159 = vector.broadcast %158 : vector<1x256xf32> to vector<128x256xf32>
    %160 = vector.broadcast %cst_42 : f32 to vector<128x256xf32>
    %161 = arith.select %157, %159, %160 : vector<128x256xi1>, vector<128x256xf32>
    %162 = vector.shape_cast %108 : vector<1x256xf32> to vector<1x256xf32>
    %163 = vector.broadcast %162 : vector<1x256xf32> to vector<128x256xf32>
    %164 = arith.select %155, %163, %161 : vector<128x256xi1>, vector<128x256xf32>
    %165 = arith.truncf %164 : vector<128x256xf32> to vector<128x256xbf16>
    %c0_i32_43 = arith.constant 0 : i32
    %166 = vector.broadcast %c0_i32_43 : i32 to vector<16x256xi32>
    %167 = arith.cmpi eq, %153, %166 : vector<16x256xi32>
    %c1_i32_44 = arith.constant 1 : i32
    %168 = vector.broadcast %c1_i32_44 : i32 to vector<16x256xi32>
    %169 = arith.cmpi eq, %153, %168 : vector<16x256xi32>
    %cst_45 = arith.constant 0.000000e+00 : f32
    %170 = vector.shape_cast %129 : vector<1x256xf32> to vector<1x256xf32>
    %171 = vector.broadcast %170 : vector<1x256xf32> to vector<16x256xf32>
    %172 = vector.broadcast %cst_45 : f32 to vector<16x256xf32>
    %173 = arith.select %169, %171, %172 : vector<16x256xi1>, vector<16x256xf32>
    %174 = vector.shape_cast %122 : vector<1x256xf32> to vector<1x256xf32>
    %175 = vector.broadcast %174 : vector<1x256xf32> to vector<16x256xf32>
    %176 = arith.select %167, %175, %173 : vector<16x256xi1>, vector<16x256xf32>
    %c0_46 = arith.constant 0 : index
    %c0_47 = arith.constant 0 : index
    %177 = vector.load %arg2[%c0_46, %c0_47] : memref<80x128xbf16, #tpu.memory_space<vmem>>, vector<16x128xbf16>
    %cst_48 = arith.constant dense<0.000000e+00> : vector<16x256xf32>
    %178 = tpu.matmul %177, %165, %cst_48 {dimension_numbers = #tpu.dot_dimension_numbers<[1], [0], [0], [1], [0, 0, 1, 1], [], []>} : vector<16x128xbf16>, vector<128x256xbf16>, vector<16x256xf32> -> vector<16x256xf32>
    %179 = arith.mulf %178, %176 : vector<16x256xf32>
    %cst_49 = arith.constant dense<0.000000e+00> : vector<256xf32>
    %180 = vector.multi_reduction <add>, %179, %cst_49 [0] : vector<16x256xf32> to vector<256xf32>
    %181 = vector.shape_cast %180 : vector<256xf32> to vector<1x256xf32>
    %c16 = arith.constant 16 : index
    %c0_50 = arith.constant 0 : index
    %182 = vector.load %arg2[%c16, %c0_50] : memref<80x128xbf16, #tpu.memory_space<vmem>>, vector<16x128xbf16>
    %cst_51 = arith.constant dense<0.000000e+00> : vector<16x256xf32>
    %183 = tpu.matmul %182, %165, %cst_51 {dimension_numbers = #tpu.dot_dimension_numbers<[1], [0], [0], [1], [0, 0, 1, 1], [], []>} : vector<16x128xbf16>, vector<128x256xbf16>, vector<16x256xf32> -> vector<16x256xf32>
    %184 = arith.mulf %183, %176 : vector<16x256xf32>
    %cst_52 = arith.constant dense<0.000000e+00> : vector<256xf32>
    %185 = vector.multi_reduction <add>, %184, %cst_52 [0] : vector<16x256xf32> to vector<256xf32>
    %186 = vector.shape_cast %185 : vector<256xf32> to vector<1x256xf32>
    %c32 = arith.constant 32 : index
    %c0_53 = arith.constant 0 : index
    %187 = vector.load %arg2[%c32, %c0_53] : memref<80x128xbf16, #tpu.memory_space<vmem>>, vector<16x128xbf16>
    %cst_54 = arith.constant dense<0.000000e+00> : vector<16x256xf32>
    %188 = tpu.matmul %187, %165, %cst_54 {dimension_numbers = #tpu.dot_dimension_numbers<[1], [0], [0], [1], [0, 0, 1, 1], [], []>} : vector<16x128xbf16>, vector<128x256xbf16>, vector<16x256xf32> -> vector<16x256xf32>
    %189 = arith.mulf %188, %176 : vector<16x256xf32>
    %cst_55 = arith.constant dense<0.000000e+00> : vector<256xf32>
    %190 = vector.multi_reduction <add>, %189, %cst_55 [0] : vector<16x256xf32> to vector<256xf32>
    %191 = vector.shape_cast %190 : vector<256xf32> to vector<1x256xf32>
    %c48 = arith.constant 48 : index
    %c0_56 = arith.constant 0 : index
    %192 = vector.load %arg2[%c48, %c0_56] : memref<80x128xbf16, #tpu.memory_space<vmem>>, vector<16x128xbf16>
    %cst_57 = arith.constant dense<0.000000e+00> : vector<16x256xf32>
    %193 = tpu.matmul %192, %165, %cst_57 {dimension_numbers = #tpu.dot_dimension_numbers<[1], [0], [0], [1], [0, 0, 1, 1], [], []>} : vector<16x128xbf16>, vector<128x256xbf16>, vector<16x256xf32> -> vector<16x256xf32>
    %194 = arith.mulf %193, %176 : vector<16x256xf32>
    %cst_58 = arith.constant dense<0.000000e+00> : vector<256xf32>
    %195 = vector.multi_reduction <add>, %194, %cst_58 [0] : vector<16x256xf32> to vector<256xf32>
    %196 = vector.shape_cast %195 : vector<256xf32> to vector<1x256xf32>
    %c64 = arith.constant 64 : index
    %c0_59 = arith.constant 0 : index
    %197 = vector.load %arg2[%c64, %c0_59] : memref<80x128xbf16, #tpu.memory_space<vmem>>, vector<16x128xbf16>
    %cst_60 = arith.constant dense<0.000000e+00> : vector<16x256xf32>
    %198 = tpu.matmul %197, %165, %cst_60 {dimension_numbers = #tpu.dot_dimension_numbers<[1], [0], [0], [1], [0, 0, 1, 1], [], []>} : vector<16x128xbf16>, vector<128x256xbf16>, vector<16x256xf32> -> vector<16x256xf32>
    %199 = arith.mulf %198, %176 : vector<16x256xf32>
    %cst_61 = arith.constant dense<0.000000e+00> : vector<256xf32>
    %200 = vector.multi_reduction <add>, %199, %cst_61 [0] : vector<16x256xf32> to vector<256xf32>
    %201 = vector.shape_cast %200 : vector<256xf32> to vector<1x256xf32>
    %202 = arith.mulf %181, %201 : vector<1x256xf32>
    %c0_62 = arith.constant 0 : index
    %c0_63 = arith.constant 0 : index
    %203 = vector.load %arg3[%c0_62, %c0_63] : memref<5x256xf32, #tpu.memory_space<vmem>>, vector<1x256xf32>
    tpu.vector_store %arg3[%c0_62, %c0_63], %202 {strides = array<i32>} : memref<5x256xf32, #tpu.memory_space<vmem>>, vector<1x256xf32>,
    %204 = arith.mulf %186, %201 : vector<1x256xf32>
    %c1_64 = arith.constant 1 : index
    %c0_65 = arith.constant 0 : index
    %205 = vector.load %arg3[%c1_64, %c0_65] : memref<5x256xf32, #tpu.memory_space<vmem>>, vector<1x256xf32>
    tpu.vector_store %arg3[%c1_64, %c0_65], %204 {strides = array<i32>} : memref<5x256xf32, #tpu.memory_space<vmem>>, vector<1x256xf32>,
    %206 = arith.mulf %191, %201 : vector<1x256xf32>
    %c2_66 = arith.constant 2 : index
    %c0_67 = arith.constant 0 : index
    %207 = vector.load %arg3[%c2_66, %c0_67] : memref<5x256xf32, #tpu.memory_space<vmem>>, vector<1x256xf32>
    tpu.vector_store %arg3[%c2_66, %c0_67], %206 {strides = array<i32>} : memref<5x256xf32, #tpu.memory_space<vmem>>, vector<1x256xf32>,
    %208 = arith.mulf %196, %201 : vector<1x256xf32>
    %c3_68 = arith.constant 3 : index
    %c0_69 = arith.constant 0 : index
    %209 = vector.load %arg3[%c3_68, %c0_69] : memref<5x256xf32, #tpu.memory_space<vmem>>, vector<1x256xf32>
    tpu.vector_store %arg3[%c3_68, %c0_69], %208 {strides = array<i32>} : memref<5x256xf32, #tpu.memory_space<vmem>>, vector<1x256xf32>,
    %c4_70 = arith.constant 4 : index
    %c0_71 = arith.constant 0 : index
    %210 = vector.load %arg3[%c4_70, %c0_71] : memref<5x256xf32, #tpu.memory_space<vmem>>, vector<1x256xf32>
    tpu.vector_store %arg3[%c4_70, %c0_71], %201 {strides = array<i32>} : memref<5x256xf32, #tpu.memory_space<vmem>>, vector<1x256xf32>,
    return
  }
  func.func @transform_0(%arg0: i32) -> i32 {
    %c0_i32 = arith.constant 0 : i32
    %c0_i32_0 = arith.constant 0 : i32
    return %c0_i32 : i32
  }
  func.func @transform_1(%arg0: i32) -> (i32, i32) {
    %c0_i32 = arith.constant 0 : i32
    %c0_i32_0 = arith.constant 0 : i32
    %c0_i32_1 = arith.constant 0 : i32
    return %c0_i32, %c0_i32_0 : i32, i32
  }
  func.func @transform_2(%arg0: i32) -> (i32, i32) {
    %c0_i32 = arith.constant 0 : i32
    %c0_i32_0 = arith.constant 0 : i32
    return %c0_i32, %arg0 : i32, i32
  }
}

</mosaic_0001>

<bundles_post_ra>
// kernel: tpu_custom_call.1
= control target key start
LH: loop header
LB: loop body
LE: loop exit
PB: predicated region body
PF: predicated region fallthrough
CT: control target
= control target key end

     0   :  { %7 = vsyncpa [#allocation5], 0  ;;  %s2506_s0 = inlined_call_operand.hbm [shape: f32[8], index: 0, kind: input, shape index: {}]   ;;  %s2507_s1 = inlined_call_operand.hbm [shape: bf16[80,128], index: 1, kind: input, shape index: {}]   ;;  %s2508_s2 = inlined_call_operand.hbm [shape: f32[5,256], index: 2, kind: output, shape index: {}]  }
   0x1   :  { %8 = vsyncpa [#allocation3], 0 }
   0x2   :  { %9 = vsyncpa [#allocation4], 0  ;;  %s15_s11 = sshll.u32 %s2506_s0, 4  ;;  %s23_s14 = sshll.u32 %s2507_s1, 4  ;;  %s16_s11 = int_to_ptr.hbm [resolvable:$true] %s15_s11  ;;  %s24_s14 = int_to_ptr.hbm [resolvable:$true] %s23_s14 }
   0x3   :  { %s1709_s15 = smov [#allocation2]   ;;  %s1710_s16 = smov [#allocation6]  }
   0x4   :  { %18 = dma.hbm_to_smem %s16_s11, 16, %s1709_s15, [#allocation5]  }
   0x5   :  { %s25_s17 = sshll.u32 %s1710_s16, 4  ;;  %s1711_s18 = smov 64   ;;  %s26_s17 = int_to_ptr.vmem [resolvable:$true] %s25_s17 }
   0x6   :  { %s1712_s19 = smov 4  }
   0x7   :  { %31 = dma.hbm_to_vmem [thread:$0]  %s24_s14, 640, %s26_s17, [#allocation3], %s1711_s18, %s1711_s18, %s1712_s19  }
   0x8   :  { %1703 = dma.done.wait [#allocation5], 16  }
   0x9   :  { %1704 = vsyncadd [#allocation5], 4294967280 }
   0xa   :  { %1705 = dma.done.wait [#allocation3], 640  }
   0xb   :  { %1706 = vsyncadd [#allocation3], 4294966656 }
   0xc   :  { %40 = sfence }
   0xd   :  { %v47_v0 = vlaneseq  ;;  %v1713_v1 = vmov 16.0   ;;  %s1558_s0 = sld [smem:[#allocation2 + $0x3]]  ;;  %v1714_v20 = vmov 0.0   ;;  %s1723_s24 = smov [#allocation7]  }
   0xe   :  { %1629 = vrcp.f32 %v1713_v1  ;;  %s1557_s1 = sld [smem:[#allocation2 + $0x2]]  ;;  %s1543_s25 = sshll.u32 %s1723_s24, 4  ;;  %s1544_s25 = int_to_ptr.vmem [resolvable:$true] %s1543_s25 }
   0xf   :  { %v48_v2 = vand.u32 127, %v47_v0  ;;  %s1556_s20 = sld [smem:[#allocation2 + $0x1]]  ;;  %s1545_s28 = sshll.u32 %s2508_s2, 4  ;;  %s1546_s28 = int_to_ptr.hbm [resolvable:$true] %s1545_s28 }
  0x10   :  { %s1840_s21 = sld [smem:[#allocation2 + $0x5]] }
  0x11   :  { %v49_v5 = vadd.s32 128, %v48_v2  ;;  %v54_v8 = vcvt.s32.f32 %v48_v2  ;;  %s1861_s22 = sld [smem:[#allocation2 + $0x4]] }
  0x12   :  { %s2029_s23 = sld [smem:[#allocation2]] }
  0x13   :  { %v55_v9 = vcvt.s32.f32 %v49_v5  ;;  %v1754_v27 = vstv %s1558_s0 }
  0x14   :  { %v1630_v3 = vpop.eup %1629  ;;  %v1770_v34 = vstv %s1557_s1 }
  0x15   :  { %v57_v4 = vmul.f32 16.0, %v1630_v3  ;;  %vm61_vm0 = vweird.f32 %v1630_v3 }
  0x17   :  { %v58_v6 = vsub.f32 1.0, %v57_v4 }
  0x19   :  { %v59_v7 = vmul.f32 %v1630_v3, %v58_v6 }
  0x1b   :  { %v60_v10 = vadd.f32 %v1630_v3, %v59_v7 }
  0x1d   :  { %v1746_v11 = vsel %vm61_vm0, %v1630_v3, %v60_v10 }
  0x1e   :  { %v63_v12 = vmul.f32 %v1746_v11, %v54_v8  ;;  %v64_v13 = vmul.f32 %v1746_v11, %v55_v9 }
  0x20   :  { %v65_v14 = vfloor.f32 %v63_v12  ;;  %v66_v15 = vfloor.f32 %v64_v13 }
  0x22   :  { %v67_v16 = vmul.f32 16.0, %v65_v14  ;;  %v68_v17 = vmul.f32 16.0, %v66_v15 }
  0x24   :  { %v69_v18 = vsub.f32 %v54_v8, %v67_v16  ;;  %v70_v19 = vsub.f32 %v55_v9, %v68_v17 }
  0x26   :  { %vm71_vm1 = vcmp.ge.f32.partialorder %v69_v18, 16.0  ;;  %vm72_vm2 = vcmp.ge.f32.partialorder %v70_v19, 16.0  ;;  %vm77_vm3 = vcmp.lt.f32.partialorder %v69_v18, 0.0  ;;  %vm78_vm4 = vcmp.lt.f32.partialorder %v70_v19, 0.0 }
  0x27   :  { %v73_v21 = vsel %vm71_vm1, 1.0, %v1714_v20  ;;  %v74_v22 = vsel %vm72_vm2, 1.0, %v1714_v20  ;;  %v79_v23 = vsel %vm77_vm3, 1.0, %v1714_v20  ;;  %v80_v24 = vsel %vm78_vm4, 1.0, %v1714_v20 }
  0x28   :  { %v75_v25 = vadd.f32 %v73_v21, %v65_v14  ;;  %v76_v26 = vadd.f32 %v74_v22, %v66_v15 }
  0x2a   :  { %v1756_v28 = vsub.f32 %v75_v25, %v79_v23  ;;  %v1758_v29 = vsub.f32 %v76_v26, %v80_v24 }
  0x2c   :  { %v83_v30 = vmul.f32 16.0, %v1756_v28  ;;  %v1763_v31 = vsub.f32 %v1756_v28, %v1754_v27  ;;  %v84_v32 = vmul.f32 16.0, %v1758_v29  ;;  %v1768_v33 = vsub.f32 %v1758_v29, %v1754_v27 }
  0x2d   :  { %v217_v26 = vsub.f32 %v1754_v27, %v1756_v28 }
  0x2e   :  { %v1772_v35 = vsub.f32 %v54_v8, %v83_v30  ;;  %v1774_v36 = vsub.f32 %v55_v9, %v84_v32  ;;  %v1781_v38 = vand.u32 2147483647, %v1763_v31  ;;  %v1788_v40 = vand.u32 2147483647, %v1768_v33 }
  0x2f   :  { %vm136_vm13 = vcmp.lt.s32.totalorder %v1763_v31, 0  ;;  %vm140_vm14 = vcmp.ne.f32.partialorder %v1763_v31, %v1763_v31  ;;  %vm258_vm4 = vweird.f32 %v1763_v31 }
  0x30   :  { %v1778_v37 = vsub.f32 %v1772_v35, %v1770_v34  ;;  %v1785_v39 = vsub.f32 %v1774_v36, %v1770_v34  ;;  %v1818_v16 = vsel %vm136_vm13, 3.1415927, %v1714_v20  ;;  %vm146_vm1 = vcmp.eq.s32.totalorder %v1781_v38, inf }
  0x31   :  { %v213_v25 = vsub.f32 %v1770_v34, %v1772_v35 }
  0x32   :  { %v1791_v41 = vand.u32 2147483647, %v1778_v37  ;;  %v1794_v42 = vand.u32 2147483647, %v1785_v39  ;;  %vm141_vm15 = vcmp.ne.f32.partialorder %v1778_v37, %v1778_v37 }
  0x33   :  { %vm1824_vm0 = vmor %vm140_vm14, %vm141_vm15  ;;  %v215_v32 = vmul.f32 %v213_v25, %v213_v25  ;;  %vm196_vm14 = vcmp.lt.s32.totalorder %v1768_v33, 0  ;;  %vm200_vm15 = vcmp.ne.f32.partialorder %v1768_v33, %v1768_v33 }
  0x34   :  { %v96_v43 = vmax.f32 %v1781_v38, %v1791_v41  ;;  %v156_v44 = vmax.f32 %v1788_v40, %v1794_v42  ;;  %v95_v58 = vmin.f32 %v1781_v38, %v1791_v41  ;;  %v155_v61 = vmin.f32 %v1788_v40, %v1794_v42 }
  0x35   :  { %vm147_vm2 = vcmp.eq.s32.totalorder %v1791_v41, inf  ;;  %vm190_vm13 = vcmp.gt.f32.partialorder %v1794_v42, %v1788_v40  ;;  %v197_v19 = vsel %vm196_vm14, 3.1415927, %v1714_v20 }
  0x36   :  { %1631 = vrcp.f32 %v96_v43  ;;  %vm102_vm5 = vweird.f32 %v96_v43  ;;  %v108_v48 = vand.u32 2147483648, %v96_v43  ;;  %v106_v51 = vand.u32 2147483647, %v96_v43  ;;  %vm1830_vm3 = vmand %vm146_vm1, %vm147_vm2 }
  0x37   :  { %1633 = vrcp.f32 %v156_v44  ;;  %v168_v52 = vand.u32 2147483648, %v156_v44  ;;  %vm162_vm7 = vweird.f32 %v156_v44  ;;  %v166_v54 = vand.u32 2147483647, %v156_v44 }
  0x38   :  { %v109_v56 = vor.u32 1.1754944e-38, %v108_v48  ;;  %vm107_vm10 = vcmp.eq.f32.partialorder %v106_v51, 8.507059e+37  ;;  %1635 = vrcp.f32 %v1763_v31  ;;  %vm201_vm1 = vcmp.ne.f32.partialorder %v1785_v39, %v1785_v39 }
  0x39   :  { %v169_v60 = vor.u32 1.1754944e-38, %v168_v52  ;;  %vm167_vm12 = vcmp.eq.f32.partialorder %v166_v54, 8.507059e+37  ;;  %v264_v54 = vand.u32 2147483648, %v1763_v31  ;;  %vm206_vm2 = vcmp.eq.s32.totalorder %v1788_v40, inf }
  0x3c   :  { %v1632_v45 = vpop.eup %1631 }
  0x3d   :  { %v1634_v46 = vpop.eup %1633  ;;  %v98_v47 = vmul.f32 %v1632_v45, %v96_v43  ;;  %vm103_vm6 = vweird.f32 %v1632_v45  ;;  %v219_v43 = vmul.f32 %v217_v26, %v217_v26 }
  0x3e   :  { %v158_v49 = vmul.f32 %v1634_v46, %v156_v44  ;;  %vm163_vm8 = vweird.f32 %v1634_v46  ;;  %vm104_vm9 = vmor %vm102_vm5, %vm103_vm6 }
  0x3f   :  { %v99_v50 = vsub.f32 1.0, %v98_v47  ;;  %vm164_vm11 = vmor %vm162_vm7, %vm163_vm8  ;;  %vm263_vm7 = vcmp.eq.f32.partialorder %v1781_v38, 8.507059e+37  ;;  %vm130_vm8 = vcmp.gt.f32.partialorder %v1791_v41, %v1781_v38 }
  0x40   :  { %v159_v53 = vsub.f32 1.0, %v158_v49  ;;  %v1636_v49 = vpop.eup %1635 }
  0x41   :  { %v100_v55 = vmul.f32 %v1632_v45, %v99_v50  ;;  %v1843_v50 = vstv %s1556_s20  ;;  %v254_v52 = vmul.f32 %v1636_v49, %v1763_v31  ;;  %vm259_vm5 = vweird.f32 %v1636_v49 }
  0x42   :  { %v160_v57 = vmul.f32 %v1634_v46, %v159_v53  ;;  %vm260_vm6 = vmor %vm258_vm4, %vm259_vm5  ;;  %vm207_vm4 = vcmp.eq.s32.totalorder %v1794_v42, inf  ;;  %v211_v42 = vand.u32 2147483648, %v1785_v39 }
  0x43   :  { %v101_v59 = vadd.f32 %v1632_v45, %v100_v55  ;;  %vm202_vm5 = vmor %vm200_vm15, %vm201_vm1 }
  0x44   :  { %v161_v62 = vadd.f32 %v1634_v46, %v160_v57  ;;  %v255_v57 = vsub.f32 1.0, %v254_v52  ;;  %v151_v52 = vand.u32 2147483648, %v1778_v37 }
  0x45   :  { %v105_v63 = vsel %vm104_vm9, %v1632_v45, %v101_v59  ;;  %v250_v59 = vstv %s1840_s21  ;;  %vm133_vm9 = vcmp.lt.f32.partialorder %v1763_v31, 0.0 }
  0x46   :  { %v110_v1 = vsel %vm107_vm10, %v109_v56, %v105_v63  ;;  %v165_v2 = vsel %vm164_vm11, %v1634_v46, %v161_v62  ;;  %v221_v46 = vadd.f32 %v219_v43, %v215_v32  ;;  %v248_v56 = vsub.f32 %v1756_v28, %v1843_v50 }
  0x47   :  { %v1804_v3 = vmul.f32 %v110_v1, %v95_v58  ;;  %v170_v4 = vsel %vm167_vm12, %v169_v60, %v165_v2  ;;  %v256_v62 = vmul.f32 %v1636_v49, %v255_v57  ;;  %v265_v2 = vor.u32 1.1754944e-38, %v264_v54 }
  0x48   :  { %v1806_v5 = vmul.f32 %v170_v4, %v155_v61  ;;  %1637 = vrsqrt.f32 %v221_v46  ;;  %vm230_vm10 = vcmp.eq.f32.partialorder %v221_v46, inf  ;;  %vm232_vm11 = vcmp.eq.f32.partialorder %v221_v46, 0.0 }
  0x49   :  { %v112_v6 = vmul.f32 %v1804_v3, %v1804_v3  ;;  %vm138_vm12 = vcmp.eq.f32.partialorder %v1778_v37, 0.0 }
  0x4a   :  { %v1812_v7 = vmul.f32 %v1806_v5, %v1806_v5 }
  0x4b   :  { %v113_v8 = vmul.f32 0.002785687, %v112_v6 }
  0x4c   :  { %v173_v9 = vmul.f32 0.002785687, %v1812_v7 }
  0x4d   :  { %v114_v10 = vadd.f32 -0.015866, %v113_v8  ;;  %v251_v8 = vmul.f32 %v250_v59, %v248_v56 }
  0x4e   :  { %v174_v12 = vadd.f32 -0.015866, %v173_v9  ;;  %v1638_v61 = vpop.eup %1637  ;;  %v257_v9 = vadd.f32 %v1636_v49, %v256_v62 }
  0x4f   :  { %v115_v13 = vmul.f32 %v114_v10, %v112_v6  ;;  %v224_v1 = vmul.f32 %v1638_v61, %v221_v46 }
  0x50   :  { %v175_v14 = vmul.f32 %v174_v12, %v1812_v7 }
  0x51   :  { %v116_v15 = vadd.f32 0.04247222, %v115_v13  ;;  %v225_v10 = vmul.f32 %v1638_v61, %v224_v1  ;;  %v261_v13 = vsel %vm260_vm6, %v1636_v49, %v257_v9  ;;  %vm208_vm6 = vmand %vm206_vm2, %vm207_vm4 }
  0x52   :  { %v176_v21 = vadd.f32 0.04247222, %v175_v14 }
  0x53   :  { %v117_v17 = vmul.f32 %v116_v15, %v112_v6  ;;  %v226_v15 = vmul.f32 0.5, %v225_v10 }
  0x54   :  { %v177_v24 = vmul.f32 %v176_v21, %v1812_v7 }
  0x55   :  { %v118_v22 = vadd.f32 -0.074975304, %v117_v17  ;;  %v266_v17 = vsel %vm263_vm7, %v265_v2, %v261_v13 }
  0x56   :  { %v178_v45 = vadd.f32 -0.074975304, %v177_v24  ;;  %v267_v21 = vmul.f32 %v266_v17, %v251_v8 }
  0x57   :  { %v119_v23 = vmul.f32 %v118_v22, %v112_v6 }
  0x58   :  { %v179_v48 = vmul.f32 %v178_v45, %v1812_v7 }
  0x59   :  { %v120_v30 = vadd.f32 0.1064488, %v119_v23  ;;  %v227_v23 = vsub.f32 1.5, %v226_v15 }
  0x5a   :  { %v180_v51 = vadd.f32 0.1064488, %v179_v48 }
  0x5b   :  { %v121_v44 = vmul.f32 %v120_v30, %v112_v6  ;;  %v233_v30 = vand.u32 2147483648, %v221_v46 }
  0x5c   :  { %v181_v55 = vmul.f32 %v180_v51, %v1812_v7 }
  0x5d   :  { %v122_v47 = vadd.f32 -0.14207031, %v121_v44 }
  0x5e   :  { %v182_v60 = vadd.f32 -0.14207031, %v181_v55 }
  0x5f   :  { %v123_v35 = vmul.f32 %v122_v47, %v112_v6  ;;  %v1715_v47 = vmov 0.7853982  }
  0x60   :  { %v183_v4 = vmul.f32 %v182_v60, %v1812_v7  ;;  %v145_v48 = vsel %vm133_vm9, 2.3561945, %v1715_v47 }
  0x61   :  { %v124_v53 = vadd.f32 0.19993454, %v123_v35 }
  0x62   :  { %v184_v12 = vadd.f32 0.19993454, %v183_v4 }
  0x63   :  { %v125_v58 = vmul.f32 %v124_v53, %v112_v6 }
  0x64   :  { %v185_v24 = vmul.f32 %v184_v12, %v1812_v7 }
  0x65   :  { %v126_v63 = vadd.f32 -0.33333147, %v125_v58 }
  0x66   :  { %v186_v26 = vadd.f32 -0.33333147, %v185_v24 }
  0x67   :  { %v127_v28 = vmul.f32 %v126_v63, %v112_v6  ;;  %v228_v6 = vmul.f32 %v1638_v61, %v227_v23  ;;  %v1716_v23 = vmov 683565275  }
  0x69   :  { %v128_v14 = vmul.f32 %v127_v28, %v1804_v3  ;;  %v229_v43 = vmul.f32 %v228_v6, %v221_v46 }
  0x6b   :  { %v129_v22 = vadd.f32 %v128_v14, %v1804_v3  ;;  %v187_v3 = vmul.f32 %v186_v26, %v1812_v7  ;;  %v231_v45 = vsel %vm230_vm10, %v221_v46, %v229_v43  ;;  %v1718_v26 = vmov 2131351028  }
  0x6c   :  { %v234_v49 = vsel %vm232_vm11, %v233_v30, %v231_v45 }
  0x6d   :  { %v131_v25 = vsub.f32 1.5707964, %v129_v22  ;;  %v188_v38 = vmul.f32 %v187_v3, %v1806_v5  ;;  %v1868_v35 = vmul.f32 %v267_v21, %v234_v49  ;;  %v1720_v3 = vmov 920167782  }
  0x6f   :  { %v132_v32 = vsel %vm130_vm8, %v131_v25, %v129_v22  ;;  %v189_v51 = vadd.f32 %v188_v38, %v1806_v5  ;;  %v1717_v25 = vmov 2475754826  }
  0x70   :  { %v134_v44 = vsub.f32 3.1415927, %v132_v32 }
  0x71   :  { %v191_v53 = vsub.f32 1.5707964, %v189_v51 }
  0x72   :  { %v135_v41 = vsel %vm133_vm9, %v134_v44, %v132_v32  ;;  %v1719_v32 = vmov 2102212464  }
  0x73   :  { %v139_v31 = vsel %vm138_vm12, %v1818_v16, %v135_v41  ;;  %v285_v16 = vstv %s1861_s22  ;;  %v192_v5 = vsel %vm190_vm13, %v191_v53, %v189_v51  ;;  %v1721_v51 = vmov 1326507024  }
  0x74   :  { %v143_v7 = vsel %vm1824_vm0, nan, %v139_v31  ;;  %vm193_vm0 = vcmp.lt.f32.partialorder %v1768_v33, 0.0  ;;  %v194_v18 = vsub.f32 3.1415927, %v192_v5 }
  0x75   :  { %v149_v46 = vsel %vm1830_vm3, %v145_v48, %v143_v7  ;;  %vm198_vm3 = vcmp.eq.f32.partialorder %v1785_v39, 0.0  ;;  %v205_v57 = vsel %vm193_vm0, 2.3561945, %v1715_v47 }
  0x76   :  { %v150_v54 = vand.u32 2147483647, %v149_v46  ;;  %v195_v56 = vsel %vm193_vm0, %v194_v18, %v192_v5 }
  0x77   :  { %v199_v58 = vsel %vm198_vm3, %v197_v19, %v195_v56 }
  0x78   :  { %v152_v37 = vor.u32 %v151_v52, %v150_v54  ;;  %v203_v62 = vsel %vm202_vm5, nan, %v199_v58 }
  0x79   :  { %v209_v63 = vsel %vm208_vm6, %v205_v57, %v203_v62 }
  0x7a   :  { %v1889_v55 = vmul.f32 %v285_v16, %v152_v37  ;;  %v210_v2 = vand.u32 2147483647, %v209_v63 }
  0x7c   :  { %v288_v60 = vand.u32 2147483647, %v1889_v55  ;;  %v291_v61 = vand.u32 2139095040, %v1889_v55  ;;  %v212_v9 = vor.u32 %v211_v42, %v210_v2 }
  0x7e   :  { %v292_v1 = vshrl.u32 %v291_v61, 23  ;;  %v295_v20 = vand.u32 8388607, %v288_v60  ;;  %v1896_v10 = vmul.f32 %v285_v16, %v212_v9 }
  0x80   :  { %v1561_v4 = vadd.s32 4294967169, %v292_v1  ;;  %v296_v8 = vor.u32 8388608, %v295_v20  ;;  %v443_v14 = vand.u32 2147483647, %v1896_v10  ;;  %v446_v15 = vand.u32 2139095040, %v1896_v10 }
  0x82   :  { %v298_v28 = vadd.s32 1, %v1561_v4  ;;  %v1898_v13 = vshll.u32 %v296_v8, 8  ;;  %v447_v21 = vshrl.u32 %v446_v15, 23  ;;  %v450_v38 = vand.u32 8388607, %v443_v14 }
  0x84   :  { %vm299_vm7 = vcmp.gt.s32.totalorder %v298_v28, 0  ;;  %v337_v45 = vand.u32 65535, %v1898_v13  ;;  %v1564_v54 = vadd.s32 4294967169, %v447_v21  ;;  %v338_v37 = vshrl.u32 %v1898_v13, 16 }
  0x85   :  { %v300_v12 = vsel %vm299_vm7, %v298_v28, 0  ;;  %v451_v61 = vor.u32 8388608, %v450_v38 }
  0x86   :  { %v301_v39 = vshrl.u32 %v300_v12, 5  ;;  %v302_v17 = vand.u32 31, %v300_v12  ;;  %v453_v62 = vadd.s32 1, %v1564_v54  ;;  %v1722_v54 = vmov 0  }
  0x88   :  { %v303_v22 = vsub.s32 32, %v302_v17  ;;  %v305_v24 = vshll.u32 %v1716_v23, %v302_v17  ;;  %v308_v6 = vshll.u32 %v1717_v25, %v302_v17  ;;  %v311_v30 = vshll.u32 %v1718_v26, %v302_v17 }
  0x89   :  { %v314_v43 = vshll.u32 %v1719_v32, %v302_v17  ;;  %v317_v44 = vshll.u32 %v1720_v3, %v302_v17  ;;  %vm320_vm8 = vcmp.lt.s32.totalorder %v301_v39, 1  ;;  %vm323_vm9 = vcmp.lt.s32.totalorder %v301_v39, 4 }
  0x8a   :  { %v306_v41 = vshrl.u32 %v1717_v25, %v303_v22  ;;  %v309_v47 = vshrl.u32 %v1718_v26, %v303_v22  ;;  %v312_v48 = vshrl.u32 %v1719_v32, %v303_v22  ;;  %v304_v49 = vshrl.u32 %v1716_v23, %v303_v22 }
  0x8b   :  { %v315_v31 = vshrl.u32 %v1720_v3, %v303_v22  ;;  %v318_v7 = vshrl.u32 %v1721_v51, %v303_v22  ;;  %vm322_vm10 = vcmp.lt.s32.totalorder %v301_v39, 3  ;;  %vm321_vm11 = vcmp.lt.s32.totalorder %v301_v39, 2 }
  0x8c   :  { %v307_v52 = vor.u32 %v306_v41, %v305_v24  ;;  %v310_v46 = vor.u32 %v309_v47, %v308_v6  ;;  %v313_v53 = vor.u32 %v312_v48, %v311_v30  ;;  %vm454_vm12 = vcmp.gt.s32.totalorder %v453_v62, 0 }
  0x8d   :  { %v316_v16 = vor.u32 %v315_v31, %v314_v43  ;;  %v319_v5 = vor.u32 %v318_v7, %v317_v44  ;;  %v1925_v24 = vshll.u32 %v451_v61, 8  ;;  %v455_v44 = vsel %vm454_vm12, %v453_v62, 0 }
  0x8e   :  { %v325_v18 = vsel %vm323_vm9, %v313_v53, 2102212464  ;;  %v328_v19 = vsel %vm320_vm8, %v307_v52, %v310_v46  ;;  %v332_v56 = vsel %vm320_vm8, %v310_v46, %v313_v53  ;;  %v324_v63 = vsel %vm320_vm8, %v304_v49, %v307_v52 }
  0x8f   :  { %v329_v57 = vsel %vm323_vm9, %v316_v16, 920167782  ;;  %v333_v58 = vsel %vm323_vm9, %v319_v5, 1326507024  ;;  %v326_v42 = vsel %vm322_vm10, %v310_v46, %v325_v18 }
  0x90   :  { %v330_v1 = vsel %vm322_vm10, %v313_v53, %v329_v57  ;;  %v334_v20 = vsel %vm322_vm10, %v316_v16, %v333_v58  ;;  %v1923_v15 = vsel %vm321_vm11, %v324_v63, %v326_v42  ;;  %v457_v53 = vand.u32 31, %v455_v44 }
  0x91   :  { %v331_v2 = vsel %vm321_vm11, %v328_v19, %v330_v1  ;;  %v335_v4 = vsel %vm321_vm11, %v332_v56, %v334_v20  ;;  %v1932_v58 = vshrl.u32 %v455_v44, 5 }
  0x92   :  { %v339_v8 = vand.u32 65535, %v335_v4  ;;  %v340_v9 = vshrl.u32 %v335_v4, 16  ;;  %v361_v28 = vand.u32 65535, %v331_v2  ;;  %v362_v12 = vshrl.u32 %v331_v2, 16 }
  0x93   :  { %v1929_v56 = vsub.s32 32, %v457_v53  ;;  %v460_v42 = vshll.u32 %v1716_v23, %v457_v53  ;;  %v463_v2 = vshll.u32 %v1717_v25, %v457_v53  ;;  %vm475_vm0 = vcmp.lt.s32.totalorder %v1932_v58, 1 }
  0x94   :  { %v341_v17 = vmul.u32 %v339_v8, %v337_v45  ;;  %v342_v21 = vmul.u32 %v340_v9, %v337_v45  ;;  %v343_v22 = vmul.u32 %v339_v8, %v338_v37  ;;  %v363_v6 = vmul.u32 %v361_v28, %v337_v45 }
  0x95   :  { %v364_v30 = vmul.u32 %v362_v12, %v337_v45  ;;  %v365_v43 = vmul.u32 %v361_v28, %v338_v37  ;;  %v344_v38 = vmul.u32 %v340_v9, %v338_v37  ;;  %v366_v48 = vmul.u32 %v362_v12, %v338_v37 }
  0x96   :  { %v345_v41 = vshll.u32 %v342_v21, 16  ;;  %v347_v47 = vshll.u32 %v343_v22, 16  ;;  %v346_v49 = vshrl.u32 %v342_v21, 16  ;;  %v348_v31 = vshrl.u32 %v343_v22, 16 }
  0x97   :  { %v367_v7 = vshll.u32 %v364_v30, 16  ;;  %v369_v52 = vshll.u32 %v365_v43, 16  ;;  %v368_v46 = vshrl.u32 %v364_v30, 16  ;;  %v370_v5 = vshrl.u32 %v365_v43, 16 }
  0x98   :  { %vm349_vm13 = vc.u32 %v341_v17, %v345_v41  ;;  %v351_v39 = vadd.s32 %v345_v41, %v341_v17  ;;  %v461_v20 = vshrl.u32 %v1717_v25, %v1929_v56  ;;  %v464_v4 = vshrl.u32 %v1718_v26, %v1929_v56 }
  0x99   :  { %v350_v16 = vsel %vm349_vm13, 1, %v1722_v54  ;;  %vm371_vm14 = vc.u32 %v363_v6, %v367_v7  ;;  %v373_v45 = vadd.s32 %v367_v7, %v363_v6  ;;  %v466_v9 = vshll.u32 %v1718_v26, %v457_v53 }
  0x9a   :  { %v352_v18 = vadd.s32 %v350_v16, %v344_v38  ;;  %vm353_vm15 = vc.u32 %v351_v39, %v347_v47  ;;  %v372_v19 = vsel %vm371_vm14, 1, %v1722_v54  ;;  %v467_v28 = vshrl.u32 %v1719_v32, %v1929_v56 }
  0x9b   :  { %v354_v37 = vsel %vm353_vm15, 1, %v1722_v54  ;;  %v374_v57 = vadd.s32 %v372_v19, %v366_v48  ;;  %vm375_vm1 = vc.u32 %v373_v45, %v369_v52  ;;  %v1935_v63 = vadd.s32 %v373_v45, %v369_v52 }
  0x9c   :  { %v356_v61 = vadd.s32 %v354_v37, %v352_v18  ;;  %v376_v62 = vsel %vm375_vm1, 1, %v1722_v54  ;;  %v469_v12 = vshll.u32 %v1719_v32, %v457_v53  ;;  %v1947_v21 = vor.u32 %v461_v20, %v460_v42 }
  0x9d   :  { %v378_v1 = vadd.s32 %v376_v62, %v374_v57  ;;  %v1949_v22 = vor.u32 %v464_v4, %v463_v2  ;;  %v470_v6 = vshrl.u32 %v1720_v3, %v1929_v56  ;;  %v1953_v30 = vor.u32 %v467_v28, %v466_v9 }
  0x9e   :  { %v357_v8 = vadd.s32 %v356_v61, %v346_v49  ;;  %v472_v43 = vshll.u32 %v1720_v3, %v457_v53  ;;  %v473_v26 = vshrl.u32 %v1721_v51, %v1929_v56  ;;  %v381_v32 = vmul.u32 %v1898_v13, %v1923_v15 }
  0x9f   :  { %v379_v17 = vadd.s32 %v378_v1, %v368_v46  ;;  %v471_v38 = vor.u32 %v470_v6, %v469_v12  ;;  %vm477_vm4 = vcmp.lt.s32.totalorder %v1932_v58, 3  ;;  %vm476_vm3 = vcmp.lt.s32.totalorder %v1932_v58, 2 }
  0xa0   :  { %v358_v25 = vadd.s32 %v357_v8, %v348_v31  ;;  %v474_v41 = vor.u32 %v473_v26, %v472_v43  ;;  %vm478_vm5 = vcmp.lt.s32.totalorder %v1932_v58, 4  ;;  %v483_v3 = vsel %vm475_vm0, %v1947_v21, %v1949_v22 }
  0xa1   :  { %v380_v44 = vadd.s32 %v379_v17, %v370_v5  ;;  %v484_v51 = vsel %vm478_vm5, %v471_v38, 920167782  ;;  %v487_v13 = vsel %vm475_vm0, %v1949_v22, %v1953_v30  ;;  %v492_v48 = vand.u32 65535, %v1925_v24 }
  0xa2   :  { %vm383_vm2 = vc.u32 %v358_v25, %v1935_v63  ;;  %v488_v15 = vsel %vm478_vm5, %v474_v41, 1326507024  ;;  %v485_v31 = vsel %vm477_vm4, %v1953_v30, %v484_v51  ;;  %v493_v52 = vshrl.u32 %v1925_v24, 16 }
  0xa3   :  { %v384_v47 = vadd.s32 1, %v380_v44  ;;  %v489_v7 = vsel %vm477_vm4, %v471_v38, %v488_v15  ;;  %v486_v46 = vsel %vm476_vm3, %v483_v3, %v485_v31  ;;  %v382_v15 = vadd.s32 %v1935_v63, %v358_v25 }
  0xa4   :  { %v490_v53 = vsel %vm476_vm3, %v487_v13, %v489_v7  ;;  %v516_v18 = vand.u32 65535, %v486_v46  ;;  %v517_v61 = vshrl.u32 %v486_v46, 16  ;;  %vm290_vm13 = vcmp.lt.s32.totalorder %v1889_v55, 0 }
  0xa5   :  { %v385_v49 = vsel %vm383_vm2, %v384_v47, %v380_v44  ;;  %v494_v16 = vand.u32 65535, %v490_v53  ;;  %v495_v5 = vshrl.u32 %v490_v53, 16  ;;  %vm289_vm14 = vcmp.le.f32.partialorder %v288_v60, 0.7853982 }
  0xa6   :  { %v386_v39 = vadd.s32 %v385_v49, %v381_v32  ;;  %v519_v4 = vmul.u32 %v517_v61, %v492_v48  ;;  %v520_v8 = vmul.u32 %v516_v18, %v493_v52  ;;  %v518_v12 = vmul.u32 %v516_v18, %v492_v48 }
  0xa7   :  { %v496_v19 = vmul.u32 %v494_v16, %v492_v48  ;;  %v497_v37 = vmul.u32 %v495_v5, %v492_v48  ;;  %v498_v57 = vmul.u32 %v494_v16, %v493_v52  ;;  %v499_v28 = vmul.u32 %v495_v5, %v493_v52 }
  0xa8   :  { %v387_v45 = vadd.s32 536870912, %v386_v39  ;;  %v522_v43 = vshll.u32 %v519_v4, 16  ;;  %v524_v26 = vshll.u32 %v520_v8, 16  ;;  %v521_v38 = vmul.u32 %v517_v61, %v493_v52 }
  0xa9   :  { %v500_v42 = vshll.u32 %v497_v37, 16  ;;  %v502_v20 = vshll.u32 %v498_v57, 16  ;;  %v501_v49 = vshrl.u32 %v497_v37, 16  ;;  %v459_v16 = vshrl.u32 %v1716_v23, %v1929_v56 }
  0xaa   :  { %v1988_v62 = vshrl.u32 %v387_v45, 30  ;;  %vm526_vm9 = vc.u32 %v518_v12, %v522_v43  ;;  %v528_v47 = vadd.s32 %v522_v43, %v518_v12  ;;  %v480_v5 = vsel %vm478_vm5, %v1953_v30, 2102212464 }
  0xab   :  { %vm504_vm6 = vc.u32 %v496_v19, %v500_v42  ;;  %v506_v2 = vadd.s32 %v500_v42, %v496_v19  ;;  %v527_v51 = vsel %vm526_vm9, 1, %v1722_v54  ;;  %v523_v45 = vshrl.u32 %v519_v4, 16 }
  0xac   :  { %v389_v1 = vshll.u32 %v1988_v62, 30  ;;  %v505_v6 = vsel %vm504_vm6, 1, %v1722_v54  ;;  %vm530_vm10 = vc.u32 %v528_v47, %v524_v26  ;;  %v529_v48 = vadd.s32 %v527_v51, %v521_v38 }
  0xad   :  { %vm508_vm8 = vc.u32 %v506_v2, %v502_v20  ;;  %v507_v41 = vadd.s32 %v505_v6, %v499_v28  ;;  %v531_v7 = vsel %vm530_vm10, 1, %v1722_v54  ;;  %v503_v19 = vshrl.u32 %v498_v57, 16 }
  0xae   :  { %v390_v9 = vsub.s32 %v386_v39, %v389_v1  ;;  %v509_v3 = vsel %vm508_vm8, 1, %v1722_v54  ;;  %v533_v18 = vadd.s32 %v531_v7, %v529_v48  ;;  %v479_v54 = vsel %vm475_vm0, %v459_v16, %v1947_v21 }
  0xaf   :  { %v511_v31 = vadd.s32 %v509_v3, %v507_v41  ;;  %v481_v23 = vsel %vm477_vm4, %v1949_v22, %v480_v5  ;;  %v525_v56 = vshrl.u32 %v520_v8, 16  ;;  %v532_v4 = vadd.s32 %v528_v47, %v524_v26 }
  0xb0   :  { %vm391_vm7 = vcmp.lt.s32.totalorder %v390_v9, 0  ;;  %v392_v17 = vsub.s32 0, %v390_v9  ;;  %v534_v1 = vadd.s32 %v533_v18, %v523_v45  ;;  %v482_v57 = vsel %vm476_vm3, %v479_v54, %v481_v23 }
  0xb1   :  { %v512_v37 = vadd.s32 %v511_v31, %v501_v49  ;;  %v412_v21 = vsub.s32 4, %v1988_v62  ;;  %v218_v38 = vsub.f32 %v1754_v27, %v1758_v29  ;;  %vm431_vm3 = vweird.f32 %v1889_v55 }
  0xb2   :  { %v393_v44 = vsel %vm391_vm7, %v392_v17, %v390_v9  ;;  %v535_v28 = vadd.s32 %v534_v1, %v525_v56  ;;  %v536_v17 = vmul.u32 %v1925_v24, %v482_v57  ;;  %v214_v24 = vsub.f32 %v1770_v34, %v1774_v36 }
  0xb3   :  { %v394_v32 = vclz %v393_v44  ;;  %v513_v2 = vadd.s32 %v512_v37, %v503_v19  ;;  %v413_v58 = vsel %vm290_vm13, %v412_v21, %v1988_v62  ;;  %vm445_vm5 = vcmp.lt.s32.totalorder %v1896_v10, 0 }
  0xb4   :  { %v539_v22 = vadd.s32 1, %v535_v28  ;;  %v2020_v47 = vsel %vm289_vm14, 0, %v413_v58  ;;  %vm2060_vm6 = vcmp.le.f32.partialorder %v443_v14, 0.7853982  ;;  %vm273_vm7 = vweird.f32 %v1768_v33 }
  0xb5   :  { %v1562_v13 = vadd.s32 4294967294, %v394_v32  ;;  %vm538_vm12 = vc.u32 %v513_v2, %v532_v4  ;;  %v432_v31 = vadd.s32 3, %v2020_v47  ;;  %v279_v14 = vand.u32 2147483648, %v1768_v33 }
  0xb6   :  { %v540_v6 = vsel %vm538_vm12, %v539_v22, %v535_v28  ;;  %vm278_vm10 = vcmp.eq.f32.partialorder %v1788_v40, 8.507059e+37 }
  0xb7   :  { %vm1563_vm11 = vcmp.lt.s32.totalorder %v1562_v13, 0  ;;  %v541_v26 = vadd.s32 %v540_v6, %v536_v17  ;;  %v600_v17 = vstv %s2029_s23 }
  0xb8   :  { %v397_v39 = vsel %vm1563_vm11, 0, %v1562_v13  ;;  %v216_v13 = vmul.f32 %v214_v24, %v214_v24 }
  0xb9   :  { %v398_v52 = vsub.s32 32, %v397_v39  ;;  %v399_v46 = vshll.u32 %v390_v9, %v397_v39  ;;  %v402_v53 = vsub.s32 4294967266, %v397_v39  ;;  %v542_v41 = vadd.s32 536870912, %v541_v26 }
  0xbb   :  { %v400_v63 = vshrl.u32 %v382_v15, %v398_v52  ;;  %v403_v25 = vadd.s32 127, %v402_v53  ;;  %v2022_v51 = vshrl.u32 %v542_v41, 30  ;;  %v220_v15 = vmul.f32 %v218_v38, %v218_v38 }
  0xbc   :  { %v433_v53 = vand.u32 3, %v432_v31 }
  0xbd   :  { %v401_v61 = vor.u32 %v400_v63, %v399_v46  ;;  %v404_v42 = vshll.u32 %v403_v25, 23  ;;  %v544_v49 = vshll.u32 %v2022_v51, 30  ;;  %v2026_v27 = vadd.f32 %v220_v15, %v216_v13 }
  0xbe   :  { %vm438_vm1 = vcmp.eq.s32.totalorder %v433_v53, 2  ;;  %vm435_vm0 = vcmp.eq.s32.totalorder %v433_v53, 0  ;;  %vm434_vm4 = vcmp.lt.s32.totalorder %v433_v53, 2  ;;  %v567_v31 = vsub.s32 4, %v2022_v51 }
  0xbf   :  { %v405_v20 = vor.u32 4788187, %v404_v42  ;;  %v408_v30 = vcvt.s32.f32 %v401_v61  ;;  %v545_v7 = vsub.s32 %v541_v26, %v544_v49  ;;  %1639 = vrsqrt.f32 %v2026_v27 }
  0xc0   :  { %1641 = vrcp.f32 %v1768_v33  ;;  %v537_v42 = vadd.s32 %v532_v4, %v513_v2  ;;  %v568_v53 = vsel %vm445_vm5, %v567_v31, %v2022_v51  ;;  %v249_v51 = vsub.f32 %v1758_v29, %v1843_v50 }
  0xc1   :  { %v406_v9 = vand.u32 2147483647, %v405_v20  ;;  %vm546_vm15 = vcmp.lt.s32.totalorder %v545_v7, 0  ;;  %v547_v46 = vsub.s32 0, %v545_v7  ;;  %vm242_vm12 = vcmp.eq.f32.partialorder %v2026_v27, inf }
  0xc3   :  { %v409_v12 = vmul.f32 %v408_v30, %v406_v9  ;;  %v548_v45 = vsel %vm546_vm15, %v547_v46, %v545_v7 }
  0xc4   :  { %v549_v18 = vclz %v548_v45 }
  0xc5   :  { %v410_v8 = vxor.u32 2147483648, %v409_v12  ;;  %v1640_v1 = vpop.eup %1639 }
  0xc6   :  { %v1565_v19 = vadd.s32 4294967294, %v549_v18  ;;  %v236_v21 = vmul.f32 %v1640_v1, %v2026_v27  ;;  %v2049_v22 = vpop.eup %1641 }
  0xc7   :  { %v411_v43 = vsel %vm290_vm13, %v410_v8, %v409_v12  ;;  %v269_v38 = vmul.f32 %v2049_v22, %v1768_v33  ;;  %vm274_vm8 = vweird.f32 %v2049_v22 }
  0xc8   :  { %v414_v44 = vsel %vm289_vm14, %v1889_v55, %v411_v43  ;;  %vm1566_vm2 = vcmp.lt.s32.totalorder %v1565_v19, 0  ;;  %v237_v24 = vmul.f32 %v1640_v1, %v236_v21  ;;  %vm2080_vm9 = vmor %vm273_vm7, %vm274_vm8  ;;  %v252_v21 = vmul.f32 %v250_v59, %v249_v51 }
  0xc9   :  { %v416_v32 = vmul.f32 %v414_v44, %v414_v44  ;;  %v552_v56 = vsel %vm1566_vm2, 0, %v1565_v19  ;;  %v270_v15 = vsub.f32 1.0, %v269_v38 }
  0xca   :  { %v553_v20 = vsub.s32 32, %v552_v56  ;;  %v554_v30 = vshll.u32 %v545_v7, %v552_v56  ;;  %v557_v57 = vsub.s32 4294967266, %v552_v56  ;;  %v238_v13 = vmul.f32 0.5, %v237_v24 }
  0xcb   :  { %v417_v3 = vmul.f32 -0.001358992, %v416_v32  ;;  %v424_v60 = vmul.f32 -0.00019511016, %v416_v32 }
  0xcc   :  { %v555_v9 = vshrl.u32 %v537_v42, %v553_v20  ;;  %v558_v28 = vadd.s32 127, %v557_v57  ;;  %v239_v7 = vsub.f32 1.5, %v238_v13  ;;  %v2076_v42 = vsel %vm2060_vm6, 0, %v568_v53 }
  0xcd   :  { %v418_v48 = vadd.f32 0.041655596, %v417_v3  ;;  %v425_v62 = vadd.f32 0.008332121, %v424_v60 }
  0xce   :  { %v556_v6 = vor.u32 %v555_v9, %v554_v30  ;;  %v559_v43 = vshll.u32 %v558_v28, 23  ;;  %v280_v30 = vor.u32 1.1754944e-38, %v279_v14  ;;  %v2086_v9 = vshrl.u32 %v47_v0, 7 }
  0xcf   :  { %v419_v34 = vmul.f32 %v418_v48, %v416_v32  ;;  %v426_v36 = vmul.f32 %v425_v62, %v416_v32 }
  0xd0   :  { %v560_v58 = vor.u32 4788187, %v559_v43  ;;  %v2101_v40 = vadd.s32 112, %v2086_v9 }
  0xd1   :  { %v420_v39 = vadd.f32 -0.4999988, %v419_v34  ;;  %v427_v52 = vadd.f32 -0.16666654, %v426_v36 }
  0xd2   :  { %v561_v41 = vand.u32 2147483647, %v560_v58  ;;  %v2104_v58 = vadd.s32 120, %v2086_v9 }
  0xd3   :  { %v421_v16 = vmul.f32 %v420_v39, %v416_v32  ;;  %v428_v5 = vmul.f32 %v427_v52, %v416_v32  ;;  %v271_v39 = vmul.f32 %v2049_v22, %v270_v15 }
  0xd5   :  { %v2031_v63 = vadd.f32 1.0, %v421_v16  ;;  %v429_v25 = vadd.f32 1.0, %v428_v5  ;;  %v272_v19 = vadd.f32 %v2049_v22, %v271_v39 }
  0xd7   :  { %v2033_v37 = vmul.f32 %v429_v25, %v414_v44  ;;  %v439_v61 = vxor.u32 2147483648, %v2031_v63  ;;  %v563_v44 = vcvt.s32.f32 %v556_v6  ;;  %v240_v25 = vmul.f32 %v1640_v1, %v239_v7 }
  0xd8   :  { %v276_v29 = vsel %vm2080_vm9, %v2049_v22, %v272_v19 }
  0xd9   :  { %v436_v54 = vxor.u32 2147483648, %v2033_v37  ;;  %v440_v23 = vsel %vm438_vm1, %v439_v61, %v2033_v37  ;;  %v564_v60 = vmul.f32 %v563_v44, %v561_v41  ;;  %v241_v28 = vmul.f32 %v240_v25, %v2026_v27 }
  0xda   :  { %v245_v41 = vand.u32 2147483648, %v2026_v27  ;;  %v2149_v25 = vadd.s32 104, %v2086_v9 }
  0xdb   :  { %v437_v2 = vsel %vm435_vm0, %v2031_v63, %v436_v54  ;;  %v565_v49 = vxor.u32 2147483648, %v564_v60 }
  0xdc   :  { %v441_v4 = vsel %vm434_vm4, %v437_v2, %v440_v23 }
  0xdd   :  { %v442_v12 = vsel %vm431_vm3, nan, %v441_v4  ;;  %v566_v36 = vsel %vm445_vm5, %v565_v49, %v564_v60  ;;  %v587_v4 = vadd.s32 3, %v2076_v42  ;;  %vm244_vm5 = vcmp.eq.f32.partialorder %v2026_v27, 0.0 }
  0xde   :  { %v598_v8 = vmul.f32 %v442_v12, %v1868_v35  ;;  %v569_v52 = vsel %vm2060_vm6, %v1896_v10, %v566_v36 }
  0xdf   :  { %v571_v16 = vmul.f32 %v569_v52, %v569_v52  ;;  %v588_v22 = vand.u32 3, %v587_v4 }
  0xe0   :  { %v601_v26 = vadd.f32 %v600_v17, %v598_v8 }
  0xe1   :  { %v572_v45 = vmul.f32 -0.001358992, %v571_v16  ;;  %v579_v18 = vmul.f32 -0.00019511016, %v571_v16  ;;  %vm593_vm6 = vcmp.eq.s32.totalorder %v588_v22, 2  ;;  %vm589_vm7 = vcmp.lt.s32.totalorder %v588_v22, 2 }
  0xe2   :  { %v915_v32 = vmul.f32 %v601_v26, %v1746_v11  ;;  %v281_v26 = vsel %vm278_vm10, %v280_v30, %v276_v29  ;;  %vm590_vm8 = vcmp.eq.s32.totalorder %v588_v22, 0  ;;  %v2165_v30 = vadd.s32 88, %v2086_v9 }
  0xe3   :  { %v573_v33 = vadd.f32 0.041655596, %v572_v45  ;;  %v580_v20 = vadd.f32 0.008332121, %v579_v18  ;;  %v2146_v18 = vadd.s32 96, %v2086_v9 }
  0xe4   :  { %v917_v3 = vmul.f32 2.0, %v915_v32  ;;  %v243_v32 = vsel %vm242_vm12, %v2026_v27, %v241_v28 }
  0xe5   :  { %v574_v1 = vmul.f32 %v573_v33, %v571_v16  ;;  %v581_v2 = vmul.f32 %v580_v20, %v571_v16  ;;  %v246_v36 = vsel %vm244_vm5, %v245_v41, %v243_v32  ;;  %v2162_v20 = vadd.s32 80, %v2086_v9 }
  0xe6   :  { %v1573_v48 = vadd.f32 -1.0, %v917_v3 }
  0xe7   :  { %v575_v8 = vadd.f32 -0.4999988, %v574_v1  ;;  %v582_v6 = vadd.f32 -0.16666654, %v581_v2 }
  0xe8   :  { %v927_v34 = vadd.f32 1.0, %v1573_v48  ;;  %v282_v48 = vmul.f32 %v281_v26, %v252_v21 }
  0xe9   :  { %v576_v59 = vmul.f32 %v575_v8, %v571_v16  ;;  %v583_v44 = vmul.f32 %v582_v6, %v571_v16 }
  0xea   :  { %v929_v46 = vmul.f32 16.0, %v927_v34  ;;  %v2137_v14 = vmul.f32 %v282_v48, %v246_v36 }
  0xeb   :  { %v2113_v60 = vadd.f32 1.0, %v576_v59  ;;  %v584_v13 = vadd.f32 1.0, %v583_v44  ;;  %v2188_v59 = vadd.s32 72, %v2086_v9 }
  0xec   :  { %v1577_v5 = vadd.f32 -1.0, %v929_v46 }
  0xed   :  { %v2123_v31 = vmul.f32 %v584_v13, %v569_v52  ;;  %v594_v34 = vxor.u32 2147483648, %v2113_v60  ;;  %v2199_v13 = vadd.s32 48, %v2086_v9 }
  0xee   :  { %v933_v23 = vmul.f32 0.5, %v1577_v5 }
  0xef   :  { %v591_v46 = vxor.u32 2147483648, %v2123_v31  ;;  %v595_v52 = vsel %vm593_vm6, %v594_v34, %v2123_v31 }
  0xf0   :  { %v943_v57 = vfloor.f32 %v933_v23 }
  0xf1   :  { %v592_v45 = vsel %vm590_vm8, %v2113_v60, %v591_v46 }
  0xf2   :  { %v947_v12 = vsub.f32 %v933_v23, %v943_v57  ;;  %vm963_vm11 = vcmp.ge.f32.partialorder %v943_v57, -1.0  ;;  %vm965_vm13 = vcmp.le.f32.partialorder %v943_v57, 14.0  ;;  %vm987_vm14 = vcmp.le.f32.partialorder %v943_v57, 16.0 }
  0xf3   :  { %vm955_vm15 = vcmp.ge.f32.partialorder %v943_v57, 0.0  ;;  %vm957_vm1 = vcmp.le.f32.partialorder %v943_v57, 15.0  ;;  %vm2096_vm0 = vmand %vm963_vm11, %vm965_vm13  ;;  %vm586_vm13 = vweird.f32 %v1896_v10  ;;  %v596_v19 = vsel %vm589_vm7, %v592_v45, %v595_v52 }
  0xf4   :  { %vm989_vm2 = vmand %vm963_vm11, %vm987_vm14  ;;  %v949_v24 = vsub.f32 1.0, %v947_v12  ;;  %v2117_v15 = vsel %vm2096_vm0, %v947_v12, 0.0  ;;  %v597_v23 = vsel %vm586_vm13, nan, %v596_v19  ;;  %v2215_v45 = vadd.s32 32, %v2086_v9 }
  0xf5   :  { %v991_v38 = vsel %vm989_vm2, %v943_v57, -1.0  ;;  %vm959_vm4 = vmand %vm955_vm15, %vm957_vm1  ;;  %v599_v33 = vmul.f32 %v597_v23, %v2137_v14  ;;  %v2218_v19 = vadd.s32 40, %v2086_v9 }
  0xf6   :  { %v2110_v3 = vcvt.f32.s32 %v991_v38  ;;  %v2126_v27 = vsel %vm959_vm4, %v949_v24, 0.0 }
  0xf7   :  { %v602_v57 = vadd.f32 %v600_v17, %v599_v33  ;;  %v2181_v17 = vadd.s32 64, %v2086_v9 }
  0xf8   :  { %v1048_v62 = vsub.s32 %v2101_v40, %v2110_v3  ;;  %v1050_v49 = vsub.s32 %v2104_v58, %v2110_v3  ;;  %v1044_v51 = vsub.s32 %v2146_v18, %v2110_v3  ;;  %v1046_v56 = vsub.s32 %v2149_v25, %v2110_v3 }
  0xf9   :  { %v1040_v28 = vsub.s32 %v2162_v20, %v2110_v3  ;;  %v1042_v29 = vsub.s32 %v2165_v30, %v2110_v3  ;;  %v916_v12 = vmul.f32 %v602_v57, %v1746_v11  ;;  %v1036_v44 = vsub.s32 %v2181_v17, %v2110_v3 }
  0xfa   :  { %vm1084_vm9 = vcmp.eq.s32.totalorder %v1048_v62, 0  ;;  %vm1086_vm10 = vcmp.eq.s32.totalorder %v1050_v49, 0  ;;  %vm1116_vm11 = vcmp.eq.s32.totalorder %v1048_v62, 1  ;;  %vm1118_vm12 = vcmp.eq.s32.totalorder %v1050_v49, 1 }
  0xfb   :  { %v1148_v7 = vsel %vm1116_vm11, %v2117_v15, 0.0  ;;  %v1150_v39 = vsel %vm1118_vm12, %v2117_v15, 0.0  ;;  %vm1112_vm14 = vcmp.eq.s32.totalorder %v1044_v51, 1  ;;  %vm1114_vm15 = vcmp.eq.s32.totalorder %v1046_v56, 1 }
  0xfc   :  { %v1180_v53 = vsel %vm1084_vm9, %v2126_v27, %v1148_v7  ;;  %v1182_v16 = vsel %vm1086_vm10, %v2126_v27, %v1150_v39  ;;  %vm1080_vm1 = vcmp.eq.s32.totalorder %v1044_v51, 0  ;;  %vm1082_vm0 = vcmp.eq.s32.totalorder %v1046_v56, 0 }
  0xfd   :  { %v2140_v5 = vpack.c.bf16 %v1182_v16, %v1180_v53  ;;  %v1144_v1 = vsel %vm1112_vm14, %v2117_v15, 0.0  ;;  %v1146_v2 = vsel %vm1114_vm15, %v2117_v15, 0.0  ;;  %vm1108_vm2 = vcmp.eq.s32.totalorder %v1040_v28, 1 }
  0xfe   :  { %v1176_v4 = vsel %vm1080_vm1, %v2126_v27, %v1144_v1  ;;  %v1178_v21 = vsel %vm1082_vm0, %v2126_v27, %v1146_v2  ;;  %vm1110_vm4 = vcmp.eq.s32.totalorder %v1042_v29, 1  ;;  %v918_v6 = vmul.f32 2.0, %v916_v12 }
  0xff   :  { %1224 = vmatpush.bf16.msra.mxu0 %v2140_v5  ;;  %1278 = vmatpush.bf16.msra.mxu2 %v2140_v5  ;;  %v2178_v8 = vpack.c.bf16 %v1178_v21, %v1176_v4  ;;  %vm1076_vm5 = vcmp.eq.s32.totalorder %v1040_v28, 0  ;;  %vm1078_vm6 = vcmp.eq.s32.totalorder %v1042_v29, 0  ;;  %v1140_v43 = vsel %vm1108_vm2, %v2117_v15, 0.0 }
 0x100   :  { %v1142_v26 = vsel %vm1110_vm4, %v2117_v15, 0.0  ;;  %v1172_v22 = vsel %vm1076_vm5, %v2126_v27, %v1140_v43  ;;  %v1574_v24 = vadd.f32 -1.0, %v918_v6  ;;  %v1038_v41 = vsub.s32 %v2188_v59, %v2110_v3 }
 0x101   :  { %v1174_v38 = vsel %vm1078_vm6, %v2126_v27, %v1142_v26  ;;  %vm1104_vm7 = vcmp.eq.s32.totalorder %v1036_v44, 1  ;;  %vm1072_vm8 = vcmp.eq.s32.totalorder %v1036_v44, 0  ;;  %v2203_v49 = vadd.s32 56, %v2086_v9 }
 0x102   :  { %v2194_v32 = vpack.c.bf16 %v1174_v38, %v1172_v22  ;;  %v928_v48 = vadd.f32 1.0, %v1574_v24  ;;  %v1136_v62 = vsel %vm1104_vm7, %v2117_v15, 0.0  ;;  %vm1074_vm9 = vcmp.eq.s32.totalorder %v1038_v41, 0 }
 0x103   :  { %1225 = vmatpush.bf16.msra.mxu0 %v2178_v8  ;;  %1279 = vmatpush.bf16.msra.mxu2 %v2178_v8  ;;  %vm1106_vm10 = vcmp.eq.s32.totalorder %v1038_v41, 1  ;;  %v1168_v36 = vsel %vm1072_vm8, %v2126_v27, %v1136_v62  ;;  %v1032_v7 = vsub.s32 %v2199_v13, %v2110_v3  ;;  %v1034_v53 = vsub.s32 %v2203_v49, %v2110_v3 }
 0x104   :  { %v930_v39 = vmul.f32 16.0, %v928_v48  ;;  %v1138_v52 = vsel %vm1106_vm10, %v2117_v15, 0.0  ;;  %v1028_v33 = vsub.s32 %v2215_v45, %v2110_v3  ;;  %v1030_v57 = vsub.s32 %v2218_v19, %v2110_v3 }
 0x105   :  { %v1170_v16 = vsel %vm1074_vm9, %v2126_v27, %v1138_v52  ;;  %vm1100_vm11 = vcmp.eq.s32.totalorder %v1032_v7, 1  ;;  %vm1068_vm12 = vcmp.eq.s32.totalorder %v1032_v7, 0  ;;  %vm1070_vm14 = vcmp.eq.s32.totalorder %v1034_v53, 0 }
 0x106   :  { %v1578_v23 = vadd.f32 -1.0, %v930_v39  ;;  %v2220_v51 = vpack.c.bf16 %v1170_v16, %v1168_v36  ;;  %vm1102_vm15 = vcmp.eq.s32.totalorder %v1034_v53, 1  ;;  %v1132_v56 = vsel %vm1100_vm11, %v2117_v15, 0.0 }
 0x107   :  { %1226 = vmatpush.bf16.msra.mxu0 %v2194_v32  ;;  %1280 = vmatpush.bf16.msra.mxu2 %v2194_v32  ;;  %v1134_v2 = vsel %vm1102_vm15, %v2117_v15, 0.0  ;;  %v1164_v4 = vsel %vm1068_vm12, %v2126_v27, %v1132_v56  ;;  %vm1096_vm1 = vcmp.eq.s32.totalorder %v1028_v33, 1  ;;  %vm1098_vm0 = vcmp.eq.s32.totalorder %v1030_v57, 1 }
 0x108   :  { %v934_v1 = vmul.f32 0.5, %v1578_v23  ;;  %v1166_v28 = vsel %vm1070_vm14, %v2126_v27, %v1134_v2  ;;  %v2233_v29 = vadd.s32 16, %v2086_v9  ;;  %vm1064_vm2 = vcmp.eq.s32.totalorder %v1028_v33, 0 }
 0x109   :  { %v2235_v21 = vpack.c.bf16 %v1166_v28, %v1164_v4  ;;  %vm1066_vm4 = vcmp.eq.s32.totalorder %v1030_v57, 0  ;;  %v1128_v6 = vsel %vm1096_vm1, %v2117_v15, 0.0  ;;  %v1130_v43 = vsel %vm1098_vm0, %v2117_v15, 0.0 }
 0x10a   :  { %v944_v12 = vfloor.f32 %v934_v1  ;;  %v2240_v26 = vadd.s32 24, %v2086_v9  ;;  %v1024_v22 = vsub.s32 %v2233_v29, %v2110_v3  ;;  %v1160_v38 = vsel %vm1064_vm2, %v2126_v27, %v1128_v6 }
 0x10b   :  { %1227 = vmatpush.bf16.msra.mxu0 %v2220_v51  ;;  %1281 = vmatpush.bf16.msra.mxu2 %v2220_v51  ;;  %v1162_v41 = vsel %vm1066_vm4, %v2126_v27, %v1130_v43  ;;  %v2275_v57 = vadd.s32 8, %v2086_v9 }
 0x10c   :  { %v948_v44 = vsub.f32 %v934_v1, %v944_v12  ;;  %vm956_vm5 = vcmp.ge.f32.partialorder %v944_v12, 0.0  ;;  %vm958_vm6 = vcmp.le.f32.partialorder %v944_v12, 15.0  ;;  %vm964_vm7 = vcmp.ge.f32.partialorder %v944_v12, -1.0 }
 0x10d   :  { %vm2246_vm8 = vmand %vm956_vm5, %vm958_vm6  ;;  %vm966_vm9 = vcmp.le.f32.partialorder %v944_v12, 14.0  ;;  %vm988_vm10 = vcmp.le.f32.partialorder %v944_v12, 16.0  ;;  %v2252_v62 = vpack.c.bf16 %v1162_v41, %v1160_v38  ;;  %v1026_v36 = vsub.s32 %v2240_v26, %v2110_v3 }
 0x10e   :  { %v950_v48 = vsub.f32 1.0, %v948_v44  ;;  %vm968_vm11 = vmand %vm964_vm7, %vm966_vm9  ;;  %vm1060_vm14 = vcmp.eq.s32.totalorder %v1024_v22, 0  ;;  %vm1092_vm15 = vcmp.eq.s32.totalorder %v1024_v22, 1 }
 0x10f   :  { %1228 = vmatpush.bf16.msra.mxu0 %v2235_v21  ;;  %1282 = vmatpush.bf16.msra.mxu2 %v2235_v21  ;;  %vm990_vm12 = vmand %vm964_vm7, %vm988_vm10  ;;  %vm1062_vm1 = vcmp.eq.s32.totalorder %v1026_v36, 0  ;;  %vm1094_vm0 = vcmp.eq.s32.totalorder %v1026_v36, 1  ;;  %v2258_v39 = vsel %vm968_vm11, %v948_v44, 0.0  ;;  %v1124_v53 = vsel %vm1092_vm15, %v2117_v15, 0.0 }
 0x110   :  { %v992_v7 = vsel %vm990_vm12, %v944_v12, -1.0  ;;  %v1126_v16 = vsel %vm1094_vm0, %v2117_v15, 0.0  ;;  %v2266_v23 = vsel %vm2246_vm8, %v950_v48, 0.0  ;;  %v2269_v56 = vsel %vm1060_vm14, %v2126_v27, %v1124_v53 }
 0x111   :  { %v2260_v52 = vcvt.f32.s32 %v992_v7  ;;  %v2272_v33 = vsel %vm1062_vm1, %v2126_v27, %v1126_v16 }
 0x113   :  { %1229 = vmatpush.bf16.msra.mxu0 %v2252_v62  ;;  %1283 = vmatpush.bf16.msra.mxu2 %v2252_v62  ;;  %v1049_v1 = vsub.s32 %v2101_v40, %v2260_v52  ;;  %v1051_v2 = vsub.s32 %v2104_v58, %v2260_v52  ;;  %v1045_v4 = vsub.s32 %v2146_v18, %v2260_v52 }
 0x114   :  { %v1047_v28 = vsub.s32 %v2149_v25, %v2260_v52  ;;  %v1041_v12 = vsub.s32 %v2162_v20, %v2260_v52  ;;  %v1043_v6 = vsub.s32 %v2165_v30, %v2260_v52  ;;  %v1037_v43 = vsub.s32 %v2181_v17, %v2260_v52 }
 0x115   :  { %v1039_v40 = vsub.s32 %v2188_v59, %v2260_v52  ;;  %vm1085_vm2 = vcmp.eq.s32.totalorder %v1049_v1, 0  ;;  %vm1087_vm4 = vcmp.eq.s32.totalorder %v1051_v2, 0  ;;  %vm1117_vm5 = vcmp.eq.s32.totalorder %v1049_v1, 1 }
 0x116   :  { %vm1119_vm6 = vcmp.eq.s32.totalorder %v1051_v2, 1  ;;  %v1149_v58 = vsel %vm1117_vm5, %v2258_v39, 0.0  ;;  %vm1081_vm7 = vcmp.eq.s32.totalorder %v1045_v4, 0  ;;  %vm1083_vm8 = vcmp.eq.s32.totalorder %v1047_v28, 0 }
 0x117   :  { %v1151_v18 = vsel %vm1119_vm6, %v2258_v39, 0.0  ;;  %v1181_v25 = vsel %vm1085_vm2, %v2266_v23, %v1149_v58  ;;  %vm1113_vm9 = vcmp.eq.s32.totalorder %v1045_v4, 1  ;;  %vm1115_vm10 = vcmp.eq.s32.totalorder %v1047_v28, 1 }
 0x118   :  { %v1183_v20 = vsel %vm1087_vm4, %v2266_v23, %v1151_v18  ;;  %v1145_v17 = vsel %vm1113_vm9, %v2258_v39, 0.0  ;;  %v1147_v59 = vsel %vm1115_vm10, %v2258_v39, 0.0  ;;  %vm1077_vm11 = vcmp.eq.s32.totalorder %v1041_v12, 0 }
 0x119   :  { %v2297_v30 = vpack.c.bf16 %v1183_v20, %v1181_v25  ;;  %v1177_v22 = vsel %vm1081_vm7, %v2266_v23, %v1145_v17  ;;  %v1179_v44 = vsel %vm1083_vm8, %v2266_v23, %v1147_v59  ;;  %vm1079_vm12 = vcmp.eq.s32.totalorder %v1043_v6, 0 }
 0x11a   :  { %vm1109_vm14 = vcmp.eq.s32.totalorder %v1041_v12, 1  ;;  %v2304_v24 = vpack.c.bf16 %v1179_v44, %v1177_v22  ;;  %vm1111_vm15 = vcmp.eq.s32.totalorder %v1043_v6, 1  ;;  %vm1073_vm1 = vcmp.eq.s32.totalorder %v1037_v43, 0 }
 0x11b   :  { %1238 = vmatpush.bf16.msra.mxu1 %v2297_v30  ;;  %v1141_v38 = vsel %vm1109_vm14, %v2258_v39, 0.0  ;;  %1292 = vmatpush.bf16.msra.mxu3 %v2297_v30  ;;  %v1143_v41 = vsel %vm1111_vm15, %v2258_v39, 0.0  ;;  %vm1075_vm0 = vcmp.eq.s32.totalorder %v1039_v40, 0  ;;  %vm1105_vm2 = vcmp.eq.s32.totalorder %v1037_v43, 1 }
 0x11c   :  { %v1173_v48 = vsel %vm1077_vm11, %v2266_v23, %v1141_v38  ;;  %v1175_v36 = vsel %vm1079_vm12, %v2266_v23, %v1143_v41  ;;  %vm1107_vm4 = vcmp.eq.s32.totalorder %v1039_v40, 1  ;;  %v1137_v7 = vsel %vm1105_vm2, %v2258_v39, 0.0 }
 0x11d   :  { %v1033_v53 = vsub.s32 %v2199_v13, %v2260_v52  ;;  %v2314_v16 = vpack.c.bf16 %v1175_v36, %v1173_v48  ;;  %v1139_v1 = vsel %vm1107_vm4, %v2258_v39, 0.0  ;;  %v1169_v2 = vsel %vm1073_vm1, %v2266_v23, %v1137_v7 }
 0x11e   :  { %v1035_v4 = vsub.s32 %v2203_v49, %v2260_v52  ;;  %v1171_v28 = vsel %vm1075_vm0, %v2266_v23, %v1139_v1  ;;  %v1029_v13 = vsub.s32 %v2215_v45, %v2260_v52  ;;  %v1020_v6 = vsub.s32 %v2086_v9, %v2110_v3 }
 0x11f   :  { %1239 = vmatpush.bf16.msra.mxu1 %v2304_v24  ;;  %1293 = vmatpush.bf16.msra.mxu3 %v2304_v24  ;;  %vm1069_vm5 = vcmp.eq.s32.totalorder %v1033_v53, 0  ;;  %vm1101_vm6 = vcmp.eq.s32.totalorder %v1033_v53, 1  ;;  %v2328_v43 = vpack.c.bf16 %v1171_v28, %v1169_v2  ;;  %v1031_v40 = vsub.s32 %v2218_v19, %v2260_v52  ;;  %v1601_v2 = vld [vmem:[#allocation6] sm:$0xff] }
 0x120   :  { %vm1071_vm7 = vcmp.eq.s32.totalorder %v1035_v4, 0  ;;  %vm1103_vm8 = vcmp.eq.s32.totalorder %v1035_v4, 1  ;;  %v1133_v12 = vsel %vm1101_vm6, %v2258_v39, 0.0  ;;  %v1022_v58 = vsub.s32 %v2275_v57, %v2110_v3  ;;  %v1602_v4 = vld [vmem:[#allocation6 + $0x8] sm:$0xff] }
 0x121   :  { %v1135_v49 = vsel %vm1103_vm8, %v2258_v39, 0.0  ;;  %v1165_v18 = vsel %vm1069_vm5, %v2266_v23, %v1133_v12  ;;  %vm1097_vm9 = vcmp.eq.s32.totalorder %v1029_v13, 1  ;;  %v2338_v45 = vpack.c.bf16 %v2272_v33, %v2269_v56 }
 0x122   :  { %v1025_v25 = vsub.s32 %v2233_v29, %v2260_v52  ;;  %v1167_v20 = vsel %vm1071_vm7, %v2266_v23, %v1135_v49  ;;  %vm1065_vm10 = vcmp.eq.s32.totalorder %v1029_v13, 0  ;;  %vm1099_vm11 = vcmp.eq.s32.totalorder %v1031_v40, 1 }
 0x123   :  { %1240 = vmatpush.bf16.msra.mxu1 %v2314_v16  ;;  %1294 = vmatpush.bf16.msra.mxu3 %v2314_v16  ;;  %v1129_v3 = vsel %vm1097_vm9, %v2258_v39, 0.0  ;;  %vm1067_vm12 = vcmp.eq.s32.totalorder %v1031_v40, 0  ;;  %v1131_v19 = vsel %vm1099_vm11, %v2258_v39, 0.0  ;;  %v1027_v56 = vsub.s32 %v2240_v26, %v2260_v52 }
 0x124   :  { %1230 = vmatpush.bf16.msra.mxu0 %v2338_v45  ;;  %vm1088_vm14 = vcmp.eq.s32.totalorder %v1020_v6, 1  ;;  %1284 = vmatpush.bf16.msra.mxu2 %v2338_v45  ;;  %vm1056_vm15 = vcmp.eq.s32.totalorder %v1020_v6, 0  ;;  %vm1058_vm1 = vcmp.eq.s32.totalorder %v1022_v58, 0  ;;  %vm1090_vm0 = vcmp.eq.s32.totalorder %v1022_v58, 1  ;;  %v1604_v6 = vld [vmem:[#allocation6 + $0x18] sm:$0xff] }
 0x125   :  { %v2351_v29 = vpack.c.bf16 %v1167_v20, %v1165_v18  ;;  %v1161_v33 = vsel %vm1065_vm10, %v2266_v23, %v1129_v3  ;;  %vm1093_vm2 = vcmp.eq.s32.totalorder %v1025_v25, 1  ;;  %vm1095_vm4 = vcmp.eq.s32.totalorder %v1027_v56, 1 }
 0x126   :  { %v1163_v17 = vsel %vm1067_vm12, %v2266_v23, %v1131_v19  ;;  %vm1061_vm5 = vcmp.eq.s32.totalorder %v1025_v25, 0  ;;  %v1120_v26 = vsel %vm1088_vm14, %v2117_v15, 0.0  ;;  %v1122_v59 = vsel %vm1090_vm0, %v2117_v15, 0.0 }
 0x127   :  { %1241 = vmatpush.bf16.msra.mxu1 %v2328_v43  ;;  %1295 = vmatpush.bf16.msra.mxu3 %v2328_v43  ;;  %vm1063_vm6 = vcmp.eq.s32.totalorder %v1027_v56, 0  ;;  %v1152_v22 = vsel %vm1056_vm15, %v2126_v27, %v1120_v26  ;;  %v1154_v44 = vsel %vm1058_vm1, %v2126_v27, %v1122_v59  ;;  %v1021_v38 = vsub.s32 %v2086_v9, %v2260_v52 }
 0x128   :  { %v1125_v41 = vsel %vm1093_vm2, %v2258_v39, 0.0  ;;  %v1127_v48 = vsel %vm1095_vm4, %v2258_v39, 0.0  ;;  %v2365_v36 = vpack.c.bf16 %v1154_v44, %v1152_v22  ;;  %v1023_v7 = vsub.s32 %v2275_v57, %v2260_v52 }
 0x129   :  { %vm1089_vm7 = vcmp.eq.s32.totalorder %v1021_v38, 1  ;;  %v2370_v15 = vpack.c.bf16 %v1163_v17, %v1161_v33  ;;  %v1157_v27 = vsel %vm1061_vm5, %v2266_v23, %v1125_v41  ;;  %v1159_v53 = vsel %vm1063_vm6, %v2266_v23, %v1127_v48 }
 0x12a   :  { %vm1091_vm8 = vcmp.eq.s32.totalorder %v1023_v7, 1  ;;  %1231 = vmatpush.bf16.msra.mxu0 %v2365_v36  ;;  %1285 = vmatpush.bf16.msra.mxu2 %v2365_v36  ;;  %vm1057_vm9 = vcmp.eq.s32.totalorder %v1021_v38, 0  ;;  %vm1059_vm10 = vcmp.eq.s32.totalorder %v1023_v7, 0  ;;  %v1121_v52 = vsel %vm1089_vm7, %v2258_v39, 0.0 }
 0x12b   :  { %1242 = vmatpush.bf16.msra.mxu1 %v2351_v29  ;;  %1296 = vmatpush.bf16.msra.mxu3 %v2351_v29  ;;  %v1123_v1 = vsel %vm1091_vm8, %v2258_v39, 0.0  ;;  %v2383_v28 = vpack.c.bf16 %v1159_v53, %v1157_v27  ;;  %v1153_v13 = vsel %vm1057_vm9, %v2266_v23, %v1121_v52 }
 0x12c   :  { %v1155_v12 = vsel %vm1059_vm10, %v2266_v23, %v1123_v1  ;;  %v1603_v23 = vld [vmem:[#allocation6 + $0x10] sm:$0xff] }
 0x12d   :  { %1232 = vmatmul.bf16.vlgmr.msra.gmra.mxu0 %v1601_v2  ;;  %1286 = vmatmul.bf16.vlgmr.msra.gmra.mxu2 %v1602_v4  ;;  %v1185_v39 = vpack.c.bf16 %v1155_v12, %v1153_v13 }
 0x12e   :  { %1332 = vmatpush.bf16.msrb.mxu0 %v2140_v5  ;;  %1386 = vmatpush.bf16.msrb.mxu2 %v2140_v5 }
 0x12f   :  { %1243 = vmatpush.bf16.msra.mxu1 %v2370_v15  ;;  %1297 = vmatpush.bf16.msra.mxu3 %v2370_v15 }
 0x132   :  { %1333 = vmatpush.bf16.msrb.mxu0 %v2178_v8  ;;  %1387 = vmatpush.bf16.msrb.mxu2 %v2178_v8 }
 0x133   :  { %1244 = vmatpush.bf16.msra.mxu1 %v2383_v28  ;;  %1298 = vmatpush.bf16.msra.mxu3 %v2383_v28 }
 0x136   :  { %1334 = vmatpush.bf16.msrb.mxu0 %v2194_v32  ;;  %1388 = vmatpush.bf16.msrb.mxu2 %v2194_v32 }
 0x137   :  { %1245 = vmatpush.bf16.msra.mxu1 %v1185_v39  ;;  %1299 = vmatpush.bf16.msra.mxu3 %v1185_v39 }
 0x13a   :  { %1335 = vmatpush.bf16.msrb.mxu0 %v2220_v51  ;;  %1389 = vmatpush.bf16.msrb.mxu2 %v2220_v51 }
 0x13b   :  { %1346 = vmatpush.bf16.msrb.mxu1 %v2297_v30  ;;  %1400 = vmatpush.bf16.msrb.mxu3 %v2297_v30 }
 0x13c   :  { %1246 = vmatmul.bf16.vlgmr.msra.gmra.mxu1 %v1601_v2  ;;  %1300 = vmatmul.bf16.vlgmr.msra.gmra.mxu3 %v1602_v4 }
 0x13e   :  { %1336 = vmatpush.bf16.msrb.mxu0 %v2235_v21  ;;  %1390 = vmatpush.bf16.msrb.mxu2 %v2235_v21 }
 0x13f   :  { %1347 = vmatpush.bf16.msrb.mxu1 %v2304_v24  ;;  %1401 = vmatpush.bf16.msrb.mxu3 %v2304_v24 }
 0x142   :  { %1337 = vmatpush.bf16.msrb.mxu0 %v2252_v62  ;;  %1391 = vmatpush.bf16.msrb.mxu2 %v2252_v62 }
 0x143   :  { %1348 = vmatpush.bf16.msrb.mxu1 %v2314_v16  ;;  %1402 = vmatpush.bf16.msrb.mxu3 %v2314_v16 }
 0x146   :  { %1338 = vmatpush.bf16.msrb.mxu0 %v2338_v45  ;;  %1392 = vmatpush.bf16.msrb.mxu2 %v2338_v45 }
 0x147   :  { %1349 = vmatpush.bf16.msrb.mxu1 %v2328_v43  ;;  %1403 = vmatpush.bf16.msrb.mxu3 %v2328_v43 }
 0x14a   :  { %1339 = vmatpush.bf16.msrb.mxu0 %v2365_v36  ;;  %1393 = vmatpush.bf16.msrb.mxu2 %v2365_v36 }
 0x14b   :  { %1350 = vmatpush.bf16.msrb.mxu1 %v2351_v29  ;;  %1404 = vmatpush.bf16.msrb.mxu3 %v2351_v29 }
 0x14d   :  { %1340 = vmatmul.bf16.vlgmr.msrb.gmra.mxu0 %v1603_v23  ;;  %1394 = vmatmul.bf16.vlgmr.msrb.gmra.mxu2 %v1604_v6 }
 0x14e   :  { %1440 = vmatpush.bf16.msra.mxu0 %v2140_v5  ;;  %v1605_v5 = vld [vmem:[#allocation6 + $0x20] sm:$0xff] }
 0x14f   :  { %1351 = vmatpush.bf16.msrb.mxu1 %v2370_v15  ;;  %1405 = vmatpush.bf16.msrb.mxu3 %v2370_v15 }
 0x152   :  { %1441 = vmatpush.bf16.msra.mxu0 %v2178_v8  ;;  %v901_v8 = vand.u32 3, %v2076_v42 }
 0x153   :  { %1352 = vmatpush.bf16.msrb.mxu1 %v2383_v28  ;;  %1406 = vmatpush.bf16.msrb.mxu3 %v2383_v28 }
 0x154   :  { %vm903_vm11 = vcmp.eq.s32.totalorder %v901_v8, 0  ;;  %vm906_vm12 = vcmp.eq.s32.totalorder %v901_v8, 2  ;;  %vm902_vm1 = vcmp.lt.s32.totalorder %v901_v8, 2 }
 0x156   :  { %1442 = vmatpush.bf16.msra.mxu0 %v2194_v32  ;;  %v747_v32 = vand.u32 3, %v2020_v47 }
 0x157   :  { %1353 = vmatpush.bf16.msrb.mxu1 %v1185_v39  ;;  %1407 = vmatpush.bf16.msrb.mxu3 %v1185_v39 }
 0x158   :  { %vm749_vm14 = vcmp.eq.s32.totalorder %v747_v32, 0  ;;  %vm752_vm15 = vcmp.eq.s32.totalorder %v747_v32, 2  ;;  %vm748_vm0 = vcmp.lt.s32.totalorder %v747_v32, 2 }
 0x159   :  { %v751_v42 = vsel %vm749_vm14, %v2031_v63, %v436_v54  ;;  %v754_v47 = vsel %vm752_vm15, %v439_v61, %v2033_v37 }
 0x15a   :  { %1443 = vmatpush.bf16.msra.mxu0 %v2220_v51  ;;  %1354 = vmatmul.bf16.vlgmr.msrb.gmra.mxu1 %v1603_v23  ;;  %v905_v51 = vsel %vm903_vm11, %v2113_v60, %v591_v46 }
 0x15b   :  { %1454 = vmatpush.bf16.msra.mxu1 %v2297_v30  ;;  %1408 = vmatmul.bf16.vlgmr.msrb.gmra.mxu3 %v1604_v6  ;;  %v755_v30 = vsel %vm748_vm0, %v751_v42, %v754_v47 }
 0x15c   :  { %v756_v46 = vsel %vm431_vm3, nan, %v755_v30 }
 0x15e   :  { %1444 = vmatpush.bf16.msra.mxu0 %v2235_v21  ;;  %v908_v21 = vsel %vm906_vm12, %v594_v34, %v2123_v31  ;;  %v911_v31 = vmul.f32 %v756_v46, %v1868_v35 }
 0x15f   :  { %1455 = vmatpush.bf16.msra.mxu1 %v2304_v24 }
 0x160   :  { %v913_v54 = vadd.f32 %v911_v31, %v1843_v50 }
 0x162   :  { %1445 = vmatpush.bf16.msra.mxu0 %v2252_v62  ;;  %v909_v62 = vsel %vm902_vm1, %v905_v51, %v908_v21  ;;  %v921_v63 = vmul.f32 %v913_v54, %v1746_v11 }
 0x163   :  { %1456 = vmatpush.bf16.msra.mxu1 %v2314_v16  ;;  %v910_v24 = vsel %vm586_vm13, nan, %v909_v62 }
 0x164   :  { %v912_v60 = vmul.f32 %v910_v24, %v2137_v14  ;;  %v923_v61 = vmul.f32 2.0, %v921_v63 }
 0x166   :  { %1446 = vmatpush.bf16.msra.mxu0 %v2338_v45  ;;  %v914_v34 = vadd.f32 %v912_v60, %v1843_v50  ;;  %v1575_v10 = vadd.f32 -1.0, %v923_v61 }
 0x167   :  { %1457 = vmatpush.bf16.msra.mxu1 %v2328_v43 }
 0x168   :  { %v922_v16 = vmul.f32 %v914_v34, %v1746_v11  ;;  %v935_v40 = vadd.f32 1.0, %v1575_v10 }
 0x16a   :  { %1447 = vmatpush.bf16.msra.mxu0 %v2365_v36  ;;  %v924_v37 = vmul.f32 2.0, %v922_v16  ;;  %v937_v58 = vmul.f32 16.0, %v935_v40 }
 0x16b   :  { %1458 = vmatpush.bf16.msra.mxu1 %v2351_v29 }
 0x16c   :  { %v1576_v43 = vadd.f32 -1.0, %v924_v37  ;;  %v1579_v35 = vadd.f32 -1.0, %v937_v58 }
 0x16d   :  { %1448 = vmatmul.bf16.vlgmr.msra.gmra.mxu0 %v1605_v5 }
 0x16e   :  { %v936_v49 = vadd.f32 1.0, %v1576_v43  ;;  %v941_v25 = vmul.f32 0.5, %v1579_v35 }
 0x16f   :  { %1459 = vmatpush.bf16.msra.mxu1 %v2370_v15 }
 0x170   :  { %v938_v55 = vmul.f32 16.0, %v936_v49  ;;  %v945_v19 = vfloor.f32 %v941_v25 }
 0x172   :  { %v1580_v14 = vadd.f32 -1.0, %v938_v55  ;;  %vm979_vm2 = vcmp.ge.f32.partialorder %v945_v19, -1.0  ;;  %vm993_vm4 = vcmp.le.f32.partialorder %v945_v19, 16.0  ;;  %v951_v48 = vsub.f32 %v941_v25, %v945_v19 }
 0x173   :  { %1460 = vmatpush.bf16.msra.mxu1 %v2383_v28  ;;  %vm995_vm6 = vmand %vm979_vm2, %vm993_vm4  ;;  %vm981_vm8 = vcmp.le.f32.partialorder %v945_v19, 14.0  ;;  %vm971_vm12 = vcmp.ge.f32.partialorder %v945_v19, 0.0  ;;  %vm973_vm14 = vcmp.le.f32.partialorder %v945_v19, 15.0 }
 0x174   :  { %v942_v45 = vmul.f32 0.5, %v1580_v14  ;;  %v997_v59 = vsel %vm995_vm6, %v945_v19, -1.0  ;;  %vm983_vm15 = vmand %vm979_vm2, %vm981_vm8  ;;  %v953_v1 = vsub.f32 1.0, %v951_v48 }
 0x175   :  { %v1611_v38 = vcvt.f32.s32 %v997_v59  ;;  %v985_v12 = vsel %vm983_vm15, %v951_v48, 0.0 }
 0x176   :  { %v946_v50 = vfloor.f32 %v942_v45 }
 0x177   :  { %1461 = vmatpush.bf16.msra.mxu1 %v1185_v39  ;;  %v1052_v7 = vsub.s32 %v2086_v9, %v1611_v38  ;;  %v1054_v15 = vsub.s32 %v2275_v57, %v1611_v38 }
 0x178   :  { %vm980_vm3 = vcmp.ge.f32.partialorder %v946_v50, -1.0  ;;  %vm994_vm13 = vcmp.le.f32.partialorder %v946_v50, 16.0  ;;  %vm982_vm7 = vcmp.le.f32.partialorder %v946_v50, 14.0  ;;  %v952_v41 = vsub.f32 %v942_v45, %v946_v50 }
 0x179   :  { %vm996_vm5 = vmand %vm980_vm3, %vm994_vm13  ;;  %vm972_vm9 = vcmp.ge.f32.partialorder %v946_v50, 0.0  ;;  %vm974_vm10 = vcmp.le.f32.partialorder %v946_v50, 15.0  ;;  %vm1206_vm4 = vcmp.eq.s32.totalorder %v1054_v15, 1  ;;  %vm1200_vm2 = vcmp.eq.s32.totalorder %v1052_v7, 0 }
 0x17a   :  { %1462 = vmatmul.bf16.vlgmr.msra.gmra.mxu1 %v1605_v5  ;;  %v998_v33 = vsel %vm996_vm5, %v946_v50, -1.0  ;;  %vm984_vm11 = vmand %vm980_vm3, %vm982_vm7  ;;  %v954_v52 = vsub.f32 1.0, %v952_v41  ;;  %vm1204_vm3 = vcmp.eq.s32.totalorder %v1052_v7, 1  ;;  %vm1202_vm7 = vcmp.eq.s32.totalorder %v1054_v15, 0 }
 0x17b   :  { %v1613_v44 = vcvt.f32.s32 %v998_v33  ;;  %vm976_vm1 = vmand %vm972_vm9, %vm974_vm10  ;;  %v986_v28 = vsel %vm984_vm11, %v952_v41, 0.0  ;;  %v1210_v6 = vsel %vm1206_vm4, %v985_v12, 0.0  ;;  %vm1491_vm9 = vcmask 1040384  }
 0x17c   :  { %vm975_vm13 = vmand %vm971_vm12, %vm973_vm14  ;;  %vm2484_vm10 = vcmp.lt.s32.totalorder %v47_v0, 256 }
 0x17d   :  { %v1053_v36 = vsub.s32 %v2086_v9, %v1613_v44  ;;  %v1055_v27 = vsub.s32 %v2275_v57, %v1613_v44  ;;  %v978_v9 = vsel %vm976_vm1, %v954_v52, 0.0  ;;  %v977_v23 = vsel %vm975_vm13, %v953_v1, 0.0 }
 0x17e   :  { %v1208_v57 = vsel %vm1204_vm3, %v985_v12, 0.0  ;;  %v1214_v21 = vsel %vm1202_vm7, %v977_v23, %v1210_v6 }
 0x17f   :  { %vm1205_vm0 = vcmp.eq.s32.totalorder %v1053_v36, 1  ;;  %vm1207_vm5 = vcmp.eq.s32.totalorder %v1055_v27, 1  ;;  %vm1201_vm6 = vcmp.eq.s32.totalorder %v1053_v36, 0  ;;  %vm1203_vm8 = vcmp.eq.s32.totalorder %v1055_v27, 0 }
 0x180   :  { %v1209_v39 = vsel %vm1205_vm0, %v986_v28, 0.0  ;;  %v1211_v5 = vsel %vm1207_vm5, %v986_v28, 0.0  ;;  %v1212_v51 = vsel %vm1200_vm2, %v977_v23, %v1208_v57 }
 0x181   :  { %v1213_v32 = vsel %vm1201_vm6, %v978_v9, %v1209_v39  ;;  %v1215_v42 = vsel %vm1203_vm8, %v978_v9, %v1211_v5 }
 0x1aa   :  { %v2457_v18 = vpop.f32.mrf.mxu0 }
 0x1ab   :  { %v1252_v24 = vmul.f32 %v2457_v18, %v1212_v51 }
 0x1b0   :  { %v2465_v56 = vpop.f32.mrf.mxu2 }
 0x1b1   :  { %v1306_v60 = vmul.f32 %v2465_v56, %v1212_v51 }
 0x1b2   :  { %v2459_v20 = vpop.f32.mrf.mxu0 }
 0x1b3   :  { %v1254_v46 = vmul.f32 %v2459_v20, %v1214_v21 }
 0x1b5   :  { %v1256_v18 = vadd.f32 %v1254_v46, %v1252_v24 }
 0x1b7   :  { %v1257_v59 = vrot.slane %v1256_v18, 4 }
 0x1b8   :  { %v1289_v22 = vpop.f32.mrf.mxu2 }
 0x1b9   :  { %v2461_v3 = vpop.f32.mrf.mxu1  ;;  %v1308_v63 = vmul.f32 %v1289_v22, %v1214_v21  ;;  %v1258_v15 = vadd.f32 %v1257_v59, %v1256_v18 }
 0x1ba   :  { %v1253_v30 = vmul.f32 %v2461_v3, %v1213_v32 }
 0x1bb   :  { %v1310_v45 = vadd.f32 %v1308_v63, %v1306_v60  ;;  %v1259_v23 = vrot.slane %v1258_v15, 2 }
 0x1bd   :  { %v1311_v22 = vrot.slane %v1310_v45, 4  ;;  %v1260_v46 = vadd.f32 %v1259_v23, %v1258_v15 }
 0x1bf   :  { %v2463_v11 = vpop.f32.mrf.mxu3  ;;  %v1312_v27 = vadd.f32 %v1311_v22, %v1310_v45 }
 0x1c0   :  { %v1307_v54 = vmul.f32 %v2463_v11, %v1213_v32 }
 0x1c1   :  { %v1249_v17 = vpop.f32.mrf.mxu1  ;;  %v1313_v57 = vrot.slane %v1312_v27, 2 }
 0x1c2   :  { %v1255_v34 = vmul.f32 %v1249_v17, %v1215_v42 }
 0x1c3   :  { %v1314_v60 = vadd.f32 %v1313_v57, %v1312_v27 }
 0x1c4   :  { %v1263_v35 = vadd.f32 %v1255_v34, %v1253_v30 }
 0x1c7   :  { %v1303_v26 = vpop.f32.mrf.mxu3 }
 0x1c8   :  { %v1309_v16 = vmul.f32 %v1303_v26, %v1215_v42  ;;  %v1264_v26 = vrot.slane %v1263_v35, 4 }
 0x1ca   :  { %v2469_v29 = vpop.f32.mrf.mxu0  ;;  %v1317_v50 = vadd.f32 %v1309_v16, %v1307_v54  ;;  %v1265_v7 = vadd.f32 %v1264_v26, %v1263_v35 }
 0x1cb   :  { %v1360_v49 = vmul.f32 %v2469_v29, %v1212_v51 }
 0x1cc   :  { %v1318_v44 = vrot.slane %v1317_v50, 4  ;;  %v1266_v39 = vrot.slane %v1265_v7, 2 }
 0x1ce   :  { %v1319_v52 = vadd.f32 %v1318_v44, %v1317_v50  ;;  %v1267_v24 = vadd.f32 %v1266_v39, %v1265_v7 }
 0x1d0   :  { %v1395_v13 = vpop.f32.mrf.mxu2  ;;  %v1320_v5 = vrot.slane %v1319_v52, 2 }
 0x1d1   :  { %v1414_v55 = vmul.f32 %v1395_v13, %v1212_v51 }
 0x1d2   :  { %v1343_v53 = vpop.f32.mrf.mxu0  ;;  %v1321_v34 = vadd.f32 %v1320_v5, %v1319_v52 }
 0x1d3   :  { %v1362_v40 = vmul.f32 %v1343_v53, %v1214_v21 }
 0x1d5   :  { %v1364_v19 = vadd.f32 %v1362_v40, %v1360_v49  ;;  %v1322_v40 = vrot.slane %v1321_v34, 1 }
 0x1d7   :  { %v1355_v2 = vpop.f32.mrf.mxu1  ;;  %v1365_v48 = vrot.slane %v1364_v19, 4 }
 0x1d8   :  { %v1397_v31 = vpop.f32.mrf.mxu2  ;;  %v1361_v37 = vmul.f32 %v1355_v2, %v1213_v32 }
 0x1d9   :  { %v1416_v58 = vmul.f32 %v1397_v31, %v1214_v21 }
 0x1db   :  { %v1418_v56 = vadd.f32 %v1416_v58, %v1414_v55 }
 0x1dd   :  { %v1419_v36 = vrot.slane %v1418_v56, 4 }
 0x1de   :  { %v1409_v4 = vpop.f32.mrf.mxu3 }
 0x1df   :  { %v1357_v47 = vpop.f32.mrf.mxu1  ;;  %v1415_v43 = vmul.f32 %v1409_v4, %v1213_v32  ;;  %v1366_v4 = vadd.f32 %v1365_v48, %v1364_v19  ;;  %v1420_v28 = vadd.f32 %v1419_v36, %v1418_v56 }
 0x1e0   :  { %v1363_v61 = vmul.f32 %v1357_v47, %v1215_v42 }
 0x1e1   :  { %v1367_v47 = vrot.slane %v1366_v4, 2 }
 0x1e2   :  { %v1371_v3 = vadd.f32 %v1363_v61, %v1361_v37  ;;  %v1268_v61 = vrot.slane %v1267_v24, 1 }
 0x1e4   :  { %v1372_v38 = vrot.slane %v1371_v3, 4 }
 0x1e6   :  { %v1411_v62 = vpop.f32.mrf.mxu3  ;;  %v1373_v1 = vadd.f32 %v1372_v38, %v1371_v3 }
 0x1e7   :  { %v1417_v10 = vmul.f32 %v1411_v62, %v1215_v42  ;;  %v1421_v62 = vrot.slane %v1420_v28, 2 }
 0x1e9   :  { %v1425_v11 = vadd.f32 %v1417_v10, %v1415_v43  ;;  %v1422_v63 = vadd.f32 %v1421_v62, %v1420_v28  ;;  %v1261_v43 = vrot.slane %v1260_v46, 1  ;;  %v1315_v10 = vrot.slane %v1314_v60, 1 }
 0x1ea   :  { %v1449_v8 = vpop.f32.mrf.mxu0 }
 0x1eb   :  { %v1468_v25 = vmul.f32 %v1449_v8, %v1212_v51  ;;  %v1426_v41 = vrot.slane %v1425_v11, 4  ;;  %v1374_v8 = vrot.slane %v1373_v1, 2  ;;  %v1423_v35 = vrot.slane %v1422_v63, 1 }
 0x1ec   :  { %v1316_v50 = vadd.f32 %v1315_v10, %v1314_v60 }
 0x1ed   :  { %v1427_v2 = vadd.f32 %v1426_v41, %v1425_v11  ;;  %v1375_v54 = vadd.f32 %v1374_v8, %v1373_v1  ;;  %v1323_v11 = vadd.f32 %v1322_v40, %v1321_v34  ;;  %v1424_v26 = vadd.f32 %v1423_v35, %v1422_v63 }
 0x1ef   :  { %v1428_v51 = vrot.slane %v1427_v2, 2  ;;  %v1376_v55 = vrot.slane %v1375_v54, 1 }
 0x1f1   :  { %v1429_v16 = vadd.f32 %v1428_v51, %v1427_v2  ;;  %v1377_v19 = vadd.f32 %v1376_v55, %v1375_v54 }
 0x1f2   :  { %v1451_v14 = vpop.f32.mrf.mxu0 }
 0x1f3   :  { %v1470_v20 = vmul.f32 %v1451_v14, %v1214_v21  ;;  %v1430_v58 = vrot.slane %v1429_v16, 1 }
 0x1f5   :  { %v1472_v17 = vadd.f32 %v1470_v20, %v1468_v25  ;;  %v1269_v25 = vadd.f32 %v1268_v61, %v1267_v24  ;;  %v1262_v20 = vadd.f32 %v1261_v43, %v1260_v46  ;;  %v1431_v56 = vadd.f32 %v1430_v58, %v1429_v16 }
 0x1f7   :  { %v1463_v33 = vpop.f32.mrf.mxu1  ;;  %v1473_v29 = vrot.slane %v1472_v17, 4 }
 0x1f8   :  { %v1469_v12 = vmul.f32 %v1463_v33, %v1213_v32 }
 0x1f9   :  { %v1474_v53 = vadd.f32 %v1473_v29, %v1472_v17 }
 0x1fb   :  { %v1475_v6 = vrot.slane %v1474_v53, 2 }
 0x1fd   :  { %v1476_v31 = vadd.f32 %v1475_v6, %v1474_v53 }
 0x1ff   :  { %v1465_v13 = vpop.f32.mrf.mxu1  ;;  %v1477_v49 = vrot.slane %v1476_v31, 1 }
 0x200   :  { %v1471_v9 = vmul.f32 %v1465_v13, %v1215_v42  ;;  %v1368_v42 = vadd.f32 %v1367_v47, %v1366_v4 }
 0x201   :  { %v1478_v3 = vadd.f32 %v1477_v49, %v1476_v31 }
 0x202   :  { %v1479_v21 = vadd.f32 %v1471_v9, %v1469_v12  ;;  %v1369_v14 = vrot.slane %v1368_v42, 1 }
 0x203   :  { %v1486_v41 = vmul.f32 %v1478_v3, %v1262_v20  ;;  %v1500_v48 = vmul.f32 %v1478_v3, %v1316_v50  ;;  %v1520_v1 = vmul.f32 %v1478_v3, %v1424_v26 }
 0x204   :  { %v1480_v30 = vrot.slane %v1479_v21, 4  ;;  %v1370_v17 = vadd.f32 %v1369_v14, %v1368_v42 }
 0x206   :  { %v1481_v32 = vadd.f32 %v1480_v30, %v1479_v21  ;;  %v1510_v36 = vmul.f32 %v1478_v3, %v1370_v17 }
 0x208   :  { %v1482_v37 = vrot.slane %v1481_v32, 2 }
 0x20a   :  { %v1483_v18 = vadd.f32 %v1482_v37, %v1481_v32 }
 0x20c   :  { %v1484_v45 = vrot.slane %v1483_v18, 1 }
 0x20e   :  { %v1485_v33 = vadd.f32 %v1484_v45, %v1483_v18 }
 0x210   :  { %v1487_v22 = vmul.f32 %v1485_v33, %v1269_v25  ;;  %v1501_v29 = vmul.f32 %v1485_v33, %v1323_v11  ;;  %v1511_v44 = vmul.f32 %v1485_v33, %v1377_v19  ;;  %v1521_v38 = vmul.f32 %v1485_v33, %v1431_v56 }
 0x211   :  { %v1532_v7 = vrot.slane %v1485_v33, 7 }
 0x212   :  { %v1490_v15 = vrot.slane %v1487_v22, 7  ;;  %v1504_v27 = vrot.slane %v1501_v29, 7  ;;  %v1514_v53 = vrot.slane %v1511_v44, 7  ;;  %v1524_v52 = vrot.slane %v1521_v38, 7 }
 0x213   :  { %v1533_v2 = vsel %vm1491_vm9, %v1478_v3, %v1532_v7 }
 0x214   :  { %v1492_v0 = vsel %vm1491_vm9, %v1486_v41, %v1490_v15  ;;  %v1505_v4 = vsel %vm1491_vm9, %v1500_v48, %v1504_v27  ;;  %v1515_v28 = vsel %vm1491_vm9, %v1510_v36, %v1514_v53  ;;  %1536 = vst.msk [vmem:[#allocation7 + $0x4] ss:$8 sm:$0x3] %vm2484_vm10, %v1533_v2  ;;  %v1525_v13 = vsel %vm1491_vm9, %v1520_v1, %v1524_v52 }
 0x215   :  { %1498 = vst.msk [vmem:[#allocation7] ss:$8 sm:$0x3] %vm2484_vm10, %v1492_v0 }
 0x216   :  { %1508 = vst.msk [vmem:[#allocation7 + $0x1] ss:$8 sm:$0x3] %vm2484_vm10, %v1505_v4 }
 0x217   :  { %1518 = vst.msk [vmem:[#allocation7 + $0x2] ss:$8 sm:$0x3] %vm2484_vm10, %v1515_v28 }
 0x218   :  { %1528 = vst.msk [vmem:[#allocation7 + $0x3] ss:$8 sm:$0x3] %vm2484_vm10, %v1525_v13 }
 0x219   :  { %1548 = dma.vmem_to_hbm [thread:$0]  %s1544_s25, 256, %s1546_s28, [#allocation4]  }
 0x21a   :  { %1707 = dma.done.wait [#allocation4], 256  }
 0x21b   :  { %1708 = vsyncadd [#allocation4], 4294967040 }
 0x21c   :  { %1553 = vsyncpa [#allocation3], 1 }
 0x21d   :  { %1554 = vsyncpa [#allocation4], 1 }
 0x21e   :  { %1555 = vsyncpa [#allocation5], 1 }

</bundles_post_ra>
